<compile_context>
chip_gen: v7x
topology: tpu7x:2x2x1
jax: 0.10.0
libtpu: 0.0.40
codegen_flags: <defaults>
</compile_context>

<pallas_src>
import jax
import jax.numpy as jnp
from jax.experimental import pallas as pl
from jax.experimental.pallas import tpu as pltpu

IN_FEATURES = 512
OUT_FEATURES = 1024


def _num_tensorcores_per_device():
    """Best-effort TensorCore count per device (v7x / v4 / v5p have 2)."""
    try:
        kind = jax.devices()[0].device_kind.lower()
    except Exception:
        return 1
    if "v7" in kind:
        return 2
    if "v4" in kind or "v5p" in kind:
        return 2
    return 1


def choose_tile_n(n=OUT_FEATURES):
    """One lane-dense N tile per TensorCore; a single tile on 1-TC chips."""
    n_tc = _num_tensorcores_per_device()
    if n_tc >= 2 and n % (n_tc * 128) == 0:
        return n // n_tc
    return n


def _quantize_per_channel(w):
    """Symmetric int8 per-output-channel quantization of an [N, K] weight."""
    amax = jnp.max(jnp.abs(w), axis=1)
    scale = jnp.where(amax > 0.0, amax / 127.0, 1.0).astype(jnp.float32)
    q = jnp.clip(jnp.round(w / scale[:, None]), -127.0, 127.0)
    return q, scale


def prepare_weights(wg, wu, *, tile_n):
    """One-time (module-init-time) repack + int8 quantization of the weights.

    Args:
      wg, wu: [N, K] f32 weights of gate_proj / up_proj (PyTorch layout).
      tile_n: N tile width the kernel will use (gate tile j packed next to
              up tile j). Must divide N and be a multiple of 128.
    Returns:
      w_packed: int8 [N // tile_n, K, 2 * tile_n]   (gate tile j | up tile j)
      s_packed: f32  [N // tile_n, 1, 2 * tile_n]   per-output-channel scales
    """
    n, k = wg.shape
    assert wu.shape == (n, k)
    assert n % tile_n == 0 and tile_n % 128 == 0
    n_tiles = n // tile_n

    qg, sg = _quantize_per_channel(wg)
    qu, su = _quantize_per_channel(wu)

    def pack_q(q):  # [N, K] -> [n_tiles, K, tile_n]
        return q.T.reshape(k, n_tiles, tile_n).transpose(1, 0, 2)

    w_packed = jnp.concatenate([pack_q(qg), pack_q(qu)], axis=-1).astype(jnp.int8)
    s_packed = jnp.concatenate(
        [sg.reshape(n_tiles, 1, tile_n), su.reshape(n_tiles, 1, tile_n)], axis=-1
    ).astype(jnp.float32)
    return w_packed, s_packed


def _linear_silu_mul_kernel(x_ref, w_ref, s_ref, o_ref):
    # x_ref: (M, K) bf16; w_ref: (1, K, 2*tn) int8; s_ref: (1, 1, 2*tn) f32.
    x = x_ref[...]
    w = w_ref[0].astype(jnp.bfloat16)          # widen in VMEM; HBM stream stays int8
    gu = jnp.dot(x, w, preferred_element_type=jnp.float32)   # one fused MXU pass
    gu = gu * s_ref[0]                         # per-channel dequant in f32
    tn = gu.shape[-1] // 2                     # lane-aligned split (tn % 128 == 0)
    g = gu[:, :tn]
    u = gu[:, tn:]
    o_ref[...] = (g * jax.nn.sigmoid(g) * u).astype(o_ref.dtype)


def linear_silu_mul(x, w_packed, s_packed):
    """x: [M, K] float; w_packed/s_packed from prepare_weights. Returns [M, N]."""
    m, k = x.shape
    n_tiles, kw, two_tn = w_packed.shape
    assert kw == k and two_tn % 256 == 0
    assert s_packed.shape == (n_tiles, 1, two_tn)
    tn = two_tn // 2
    n = n_tiles * tn

    x_bf16 = x.astype(jnp.bfloat16)  # cast once in the wrapper, not per grid step

    # TODO(synk): in a decode-style loop, hide the weight DMA behind the
    # previous layer via a cross-pallas_call prefetch (P10) instead of paying
    # the exposed ~1 us HBM stream here.
    return pl.pallas_call(
        _linear_silu_mul_kernel,
        out_shape=jax.ShapeDtypeStruct((m, n), x.dtype),
        grid_spec=pltpu.PrefetchScalarGridSpec(
            num_scalar_prefetch=0,
            grid=(n_tiles,),
            in_specs=[
                pl.BlockSpec((m, k), lambda j: (0, 0)),              # activations
                pl.BlockSpec((1, k, two_tn), lambda j: (j, 0, 0)),   # gate|up int8 tile
                pl.BlockSpec((1, 1, two_tn), lambda j: (j, 0, 0)),   # dequant scales
            ],
            out_specs=pl.BlockSpec((m, tn), lambda j: (0, j)),
        ),
        compiler_params=pltpu.CompilerParams(
            dimension_semantics=("parallel",),   # shards N tiles across v7x TCs
        ),
    )(x_bf16, w_packed, s_packed)


if __name__ == "__main__":
    key = jax.random.PRNGKey(0)
    kx, kg, ku = jax.random.split(key, 3)

    M = 8  # small batch of rows
    x = jax.random.normal(kx, (M, IN_FEATURES), dtype=jnp.float32)

    # nn.Linear-style uniform(-1/sqrt(in), 1/sqrt(in)) init, bias=False.
    bound = 1.0 / (IN_FEATURES ** 0.5)
    wg = jax.random.uniform(kg, (OUT_FEATURES, IN_FEATURES), jnp.float32, -bound, bound)
    wu = jax.random.uniform(ku, (OUT_FEATURES, IN_FEATURES), jnp.float32, -bound, bound)

    tile_n = choose_tile_n(OUT_FEATURES)   # 512 on 2-TC chips (v7x), 1024 on 1-TC
    w_packed, s_packed = jax.block_until_ready(
        prepare_weights(wg, wu, tile_n=tile_n))

    out = jax.jit(linear_silu_mul)(x, w_packed, s_packed)
    out = jax.block_until_ready(out)
    assert out.shape == (M, OUT_FEATURES)
    assert out.dtype == x.dtype

    # Reference 1: exactly the math the kernel performs (bf16 x, int8 weights,
    # f32 accumulate, per-channel scale applied in f32).
    x_r = x.astype(jnp.bfloat16).astype(jnp.float32)
    qg, sg = _quantize_per_channel(wg)
    qu, su = _quantize_per_channel(wu)
    g_ref = (x_r @ qg.T) * sg[None, :]
    u_ref = (x_r @ qu.T) * su[None, :]
    ref = g_ref * jax.nn.sigmoid(g_ref) * u_ref
    max_err = float(jnp.max(jnp.abs(out - ref)))
    assert jnp.allclose(out, ref, atol=1e-2, rtol=1e-2), max_err

    # Reference 2: looser check vs the pure-f32 PyTorch-equivalent module
    # (per-channel int8 weights carry ~1% relative error, similar to bf16).
    g32 = x @ wg.T
    u32 = x @ wu.T
    ref32 = g32 * jax.nn.sigmoid(g32) * u32
    assert jnp.allclose(out, ref32, atol=8e-2, rtol=8e-2)

    print("KERNEL_OK")
</pallas_src>

<mosaic_0001>
module attributes {stable_mosaic.version = 11 : i64} {
  func.func @_linear_silu_mul_kernel(%arg0: i32, %arg1: memref<8x512xbf16, #tpu.memory_space<vmem>>, %arg2: memref<1x512x2048xi8, #tpu.memory_space<vmem>>, %arg3: memref<1x1x2048xf32, #tpu.memory_space<vmem>>, %arg4: memref<8x1024xf32, #tpu.memory_space<vmem>>) attributes {dimension_semantics = [#tpu.dimension_semantics<parallel>], iteration_bounds = array<i64: 1>, scalar_prefetch = 0 : i64, scratch_operands = 0 : i64, tpu.core_type = #tpu.core_type<tc>, window_params = [{pipeline_mode = #tpu.pipeline_mode<synchronous>, transform_indices = @transform_0, window_bounds = array<i64: 8, 512>}, {transform_indices = @transform_1, window_bounds = array<i64: 1, 512, 2048>}, {transform_indices = @transform_2, window_bounds = array<i64: 1, 1, 2048>}, {transform_indices = @transform_3, window_bounds = array<i64: 8, 1024>}]} {
    %c0 = arith.constant 0 : index
    %c0_0 = arith.constant 0 : index
    %0 = vector.load %arg1[%c0, %c0_0] : memref<8x512xbf16, #tpu.memory_space<vmem>>, vector<8x512xbf16>
    %c0_1 = arith.constant 0 : index
    %c0_2 = arith.constant 0 : index
    %c0_3 = arith.constant 0 : index
    %1 = vector.load %arg2[%c0_1, %c0_2, %c0_3] : memref<1x512x2048xi8, #tpu.memory_space<vmem>>, vector<1x512x2048xi8>
    %2 = vector.shape_cast %1 : vector<1x512x2048xi8> to vector<512x2048xi8>
    %3 = arith.sitofp %2 : vector<512x2048xi8> to vector<512x2048xbf16>
    %cst = arith.constant dense<0.000000e+00> : vector<8x2048xf32>
    %4 = tpu.matmul %0, %3, %cst {dimension_numbers = #tpu.dot_dimension_numbers<[1], [0], [0], [1], [0, 0, 1, 1], [], []>} : vector<8x512xbf16>, vector<512x2048xbf16>, vector<8x2048xf32> -> vector<8x2048xf32>
    %c0_4 = arith.constant 0 : index
    %c0_5 = arith.constant 0 : index
    %c0_6 = arith.constant 0 : index
    %5 = vector.load %arg3[%c0_4, %c0_5, %c0_6] : memref<1x1x2048xf32, #tpu.memory_space<vmem>>, vector<1x1x2048xf32>
    %6 = vector.shape_cast %5 : vector<1x1x2048xf32> to vector<1x2048xf32>
    %7 = vector.broadcast %6 : vector<1x2048xf32> to vector<8x2048xf32>
    %8 = arith.mulf %4, %7 : vector<8x2048xf32>
    %9 = vector.extract_strided_slice %8 {offsets = [0, 0], sizes = [8, 1024], strides = [1, 1]} : vector<8x2048xf32> to vector<8x1024xf32>
    %10 = vector.extract_strided_slice %8 {offsets = [0, 1024], sizes = [8, 1024], strides = [1, 1]} : vector<8x2048xf32> to vector<8x1024xf32>
    %11 = arith.negf %9 : vector<8x1024xf32>
    %12 = math.exp %11 : vector<8x1024xf32>
    %cst_7 = arith.constant 1.000000e+00 : f32
    %13 = vector.broadcast %cst_7 : f32 to vector<8x1024xf32>
    %14 = arith.addf %13, %12 : vector<8x1024xf32>
    %15 = arith.divf %13, %14 : vector<8x1024xf32>
    %16 = arith.mulf %9, %15 : vector<8x1024xf32>
    %17 = arith.mulf %16, %10 : vector<8x1024xf32>
    %c0_8 = arith.constant 0 : index
    %c0_9 = arith.constant 0 : index
    %18 = vector.load %arg4[%c0_8, %c0_9] : memref<8x1024xf32, #tpu.memory_space<vmem>>, vector<8x1024xf32>
    tpu.vector_store %arg4[%c0_8, %c0_9], %17 {strides = array<i32>} : memref<8x1024xf32, #tpu.memory_space<vmem>>, vector<8x1024xf32>,
    return
  }
  func.func @transform_0(%arg0: i32) -> (i32, i32) {
    %c0_i32 = arith.constant 0 : i32
    %c0_i32_0 = arith.constant 0 : i32
    %c0_i32_1 = arith.constant 0 : i32
    return %c0_i32, %c0_i32_0 : i32, i32
  }
  func.func @transform_1(%arg0: i32) -> (i32, i32, i32) {
    %c0_i32 = arith.constant 0 : i32
    %c0_i32_0 = arith.constant 0 : i32
    %c0_i32_1 = arith.constant 0 : i32
    return %arg0, %c0_i32, %c0_i32_0 : i32, i32, i32
  }
  func.func @transform_2(%arg0: i32) -> (i32, i32, i32) {
    %c0_i32 = arith.constant 0 : i32
    %c0_i32_0 = arith.constant 0 : i32
    %c0_i32_1 = arith.constant 0 : i32
    return %arg0, %c0_i32, %c0_i32_0 : i32, i32, i32
  }
  func.func @transform_3(%arg0: i32) -> (i32, i32) {
    %c0_i32 = arith.constant 0 : i32
    %c0_i32_0 = arith.constant 0 : i32
    return %c0_i32, %arg0 : i32, i32
  }
}

</mosaic_0001>

<bundles_post_ra>
// kernel: linear_silu_mul.1
= control target key start
LH: loop header
LB: loop body
LE: loop exit
PB: predicated region body
PF: predicated region fallthrough
CT: control target
= control target key end

     0   :  { %8 = vsyncpa [#allocation3], 0  ;;  %s1954_s0 = inlined_call_operand.vmem [shape: bf16[8,512], index: 0, kind: input, shape index: {}]   ;;  %s1955_s1 = inlined_call_operand.hbm [shape: s8[1,512,2048], index: 1, kind: input, shape index: {}]   ;;  %s1956_s2 = inlined_call_operand.vmem [shape: f32[1,1,2048], index: 2, kind: input, shape index: {}]   ;;  %s1957_s3 = inlined_call_operand.hbm [shape: f32[8,1024], index: 3, kind: output, shape index: {}]  }
   0x1   :  { %9 = vsyncpa [#allocation4], 0  ;;  %s1788_s12 = smov [#allocation2]   ;;  %s1740_s16 = scalar_lea.hbm %s1955_s1, 32768 }
   0x2   :  { %s17_s13 = sshll.u32 %s1788_s12, 4  ;;  %p1741_p0 = scmp.ne.s32.totalorder %s1955_s1, %s1740_s16  ;;  %s18_s13 = int_to_ptr.vmem [resolvable:$true] %s17_s13 }
   0x3   :  { %p1744_p1 = scmp.lt.u32.totalorder %s1740_s16, %s1955_s1 }
   0x5   :  { %p1746_p2 = pnand %p1744_p1, %p1741_p0 }
   0x7   :  { %1749 = shalt.err (!%p1746_p2)
}
   0x8   :  { %s1750_s21 = scalar_lea.vmem %s18_s13, 32768  ;;  %p1755_p4 = scmp.lt.s32.totalorder %s18_s13, %s18_s13 }
   0x9   :  { %p1751_p3 = scmp.ne.s32.totalorder %s18_s13, %s1750_s21  ;;  %p1756_p5 = scmp.lt.s32.totalorder %s1750_s21, %s1750_s21 }
   0xb   :  { %p1757_p6 = por %p1756_p5, %p1755_p4 }
   0xd   :  { %p1758_p7 = pnand %p1757_p6, %p1751_p3 }
   0xf   :  { %1761 = shalt.err (!%p1758_p7)
}
  0x10   :  { %s1789_s22 = smov 2048   ;;  %s1790_s23 = smov 128  }
  0x11   :  { %23 = dma.hbm_to_vmem [thread:$0]  %s1955_s1, 32768, %s18_s13, [#allocation3], %s1789_s22, %s1789_s22, %s1790_s23  }
  0x12   :  { %1784 = dma.done.wait [#allocation3], 32768  }
  0x13   :  { %1785 = vsyncadd [#allocation3], 4294934528  ;;  %v32_v0 = vld [vmem:[#allocation2 + $0x8] sm:$0xff]  ;;  %v34_v1 = vld [vmem:[#allocation2 + $0x18] sm:$0xff] }
  0x14   :  { %v31_v2 = vld [vmem:[#allocation2] sm:$0xff]  ;;  %v288_v3 = vunpack.c.l.s8.bf16 %v32_v0  ;;  %v304_v4 = vunpack.c.h.s8.bf16 %v32_v0  ;;  %v290_v5 = vunpack.c.l.s8.bf16 %v34_v1  ;;  %v306_v6 = vunpack.c.h.s8.bf16 %v34_v1  ;;  %v33_v7 = vld [vmem:[#allocation2 + $0x10] sm:$0xff]  ;;  %v48_v10 = vld [vmem:[#allocation2 + $0x88] sm:$0xff] }
  0x15   :  { %v287_v8 = vunpack.c.l.s8.bf16 %v31_v2  ;;  %v289_v9 = vunpack.c.l.s8.bf16 %v33_v7  ;;  %v50_v11 = vld [vmem:[#allocation2 + $0x98] sm:$0xff]  ;;  %v303_v12 = vunpack.c.h.s8.bf16 %v31_v2  ;;  %v305_v13 = vunpack.c.h.s8.bf16 %v33_v7  ;;  %v47_v16 = vld [vmem:[#allocation2 + $0x80] sm:$0xff]  ;;  %v49_v17 = vld [vmem:[#allocation2 + $0x90] sm:$0xff] }
  0x16   :  { %813 = vmatprep.subr.bf16.mxu0 %v288_v3  ;;  %895 = vmatprep.subr.bf16.mxu1 %v290_v5  ;;  %v320_v14 = vunpack.c.l.s8.bf16 %v48_v10  ;;  %v322_v15 = vunpack.c.l.s8.bf16 %v50_v11  ;;  %v319_v18 = vunpack.c.l.s8.bf16 %v47_v16  ;;  %v321_v19 = vunpack.c.l.s8.bf16 %v49_v17  ;;  %v64_v22 = vld [vmem:[#allocation2 + $0x108] sm:$0xff]  ;;  %v66_v23 = vld [vmem:[#allocation2 + $0x118] sm:$0xff]  ;;  %v63_v28 = vld [vmem:[#allocation2 + $0x100] sm:$0xff] }
  0x17   :  { %814 = vmatpush1.bf16.msra.mxu0 %v287_v8  ;;  %896 = vmatpush1.bf16.msra.mxu1 %v289_v9  ;;  %v336_v20 = vunpack.c.h.s8.bf16 %v48_v10  ;;  %v338_v21 = vunpack.c.h.s8.bf16 %v50_v11  ;;  %v335_v24 = vunpack.c.h.s8.bf16 %v47_v16  ;;  %v337_v25 = vunpack.c.h.s8.bf16 %v49_v17  ;;  %v65_v29 = vld [vmem:[#allocation2 + $0x110] sm:$0xff]  ;;  %v80_v36 = vld [vmem:[#allocation2 + $0x188] sm:$0xff]  ;;  %v82_v37 = vld [vmem:[#allocation2 + $0x198] sm:$0xff] }
  0x18   :  { %815 = vmatprep.subr.bf16.mxu0 %v304_v4  ;;  %897 = vmatprep.subr.bf16.mxu1 %v306_v6  ;;  %v352_v26 = vunpack.c.l.s8.bf16 %v64_v22  ;;  %v354_v27 = vunpack.c.l.s8.bf16 %v66_v23  ;;  %v1827_v30 = vld [vmem:[%s1954_s0] sm:$0xff]  ;;  %v351_v31 = vunpack.c.l.s8.bf16 %v63_v28  ;;  %v353_v32 = vunpack.c.l.s8.bf16 %v65_v29  ;;  %v79_v42 = vld [vmem:[#allocation2 + $0x180] sm:$0xff]  ;;  %v96_v48 = vld [vmem:[#allocation2 + $0x208] sm:$0xff] }
  0x19   :  { %v368_v33 = vunpack.c.h.s8.bf16 %v64_v22  ;;  %v370_v34 = vunpack.c.h.s8.bf16 %v66_v23  ;;  %v1831_v35 = vcombine.high %v1827_v30, %v1827_v30  ;;  %v367_v38 = vunpack.c.h.s8.bf16 %v63_v28  ;;  %v81_v43 = vld [vmem:[#allocation2 + $0x190] sm:$0xff]  ;;  %v98_v49 = vld [vmem:[#allocation2 + $0x218] sm:$0xff]  ;;  %v95_v54 = vld [vmem:[#allocation2 + $0x200] sm:$0xff] }
  0x1a   :  { %v369_v39 = vunpack.c.h.s8.bf16 %v65_v29  ;;  %v384_v40 = vunpack.c.l.s8.bf16 %v80_v36  ;;  %v386_v41 = vunpack.c.l.s8.bf16 %v82_v37  ;;  %v383_v44 = vunpack.c.l.s8.bf16 %v79_v42  ;;  %v97_v55 = vld [vmem:[#allocation2 + $0x210] sm:$0xff]  ;;  %v112_v60 = vld [vmem:[#allocation2 + $0x288] sm:$0xff]  ;;  %v114_v61 = vld [vmem:[#allocation2 + $0x298] sm:$0xff] }
  0x1b   :  { %816 = vmatpush1.bf16.msra.mxu0 %v303_v12  ;;  %898 = vmatpush1.bf16.msra.mxu1 %v305_v13  ;;  %v385_v45 = vunpack.c.l.s8.bf16 %v81_v43  ;;  %v400_v46 = vunpack.c.h.s8.bf16 %v80_v36  ;;  %v402_v47 = vunpack.c.h.s8.bf16 %v82_v37  ;;  %v399_v50 = vunpack.c.h.s8.bf16 %v79_v42  ;;  %v111_v2 = vld [vmem:[#allocation2 + $0x280] sm:$0xff]  ;;  %v113_v3 = vld [vmem:[#allocation2 + $0x290] sm:$0xff]  ;;  %v128_v8 = vld [vmem:[#allocation2 + $0x308] sm:$0xff] }
  0x1c   :  { %817 = vmatprep.subr.bf16.mxu0 %v320_v14  ;;  %899 = vmatprep.subr.bf16.mxu1 %v322_v15  ;;  %v401_v51 = vunpack.c.h.s8.bf16 %v81_v43  ;;  %v416_v52 = vunpack.c.l.s8.bf16 %v96_v48  ;;  %v418_v53 = vunpack.c.l.s8.bf16 %v98_v49  ;;  %v415_v56 = vunpack.c.l.s8.bf16 %v95_v54  ;;  %v130_v9 = vld [vmem:[#allocation2 + $0x318] sm:$0xff]  ;;  %v127_v14 = vld [vmem:[#allocation2 + $0x300] sm:$0xff]  ;;  %v129_v15 = vld [vmem:[#allocation2 + $0x310] sm:$0xff] }
  0x1d   :  { %845 = vmatprep.mubr.bf16.mxu0 %v1831_v35  ;;  %927 = vmatprep.mubr.bf16.mxu1 %v1831_v35  ;;  %v417_v57 = vunpack.c.l.s8.bf16 %v97_v55  ;;  %v432_v58 = vunpack.c.h.s8.bf16 %v96_v48  ;;  %v434_v59 = vunpack.c.h.s8.bf16 %v98_v49  ;;  %v431_v62 = vunpack.c.h.s8.bf16 %v95_v54  ;;  %v1842_v43 = vld [vmem:[%s1954_s0 + $0x8] sm:$0xff]  ;;  %v176_v48 = vld [vmem:[#allocation2 + $0x488] sm:$0xff]  ;;  %v175_v54 = vld [vmem:[#allocation2 + $0x480] sm:$0xff] }
  0x1e   :  { %v433_v63 = vunpack.c.h.s8.bf16 %v97_v55  ;;  %v448_v0 = vunpack.c.l.s8.bf16 %v112_v60  ;;  %v450_v1 = vunpack.c.l.s8.bf16 %v114_v61  ;;  %v447_v4 = vunpack.c.l.s8.bf16 %v111_v2  ;;  %v178_v49 = vld [vmem:[#allocation2 + $0x498] sm:$0xff]  ;;  %v177_v55 = vld [vmem:[#allocation2 + $0x490] sm:$0xff] }
  0x1f   :  { %818 = vmatpush1.bf16.msra.mxu0 %v319_v18  ;;  %900 = vmatpush1.bf16.msra.mxu1 %v321_v19  ;;  %v449_v5 = vunpack.c.l.s8.bf16 %v113_v3  ;;  %v464_v6 = vunpack.c.h.s8.bf16 %v112_v60  ;;  %v466_v7 = vunpack.c.h.s8.bf16 %v114_v61  ;;  %v463_v10 = vunpack.c.h.s8.bf16 %v111_v2  ;;  %v192_v60 = vld [vmem:[#allocation2 + $0x508] sm:$0xff]  ;;  %v194_v61 = vld [vmem:[#allocation2 + $0x518] sm:$0xff]  ;;  %v191_v2 = vld [vmem:[#allocation2 + $0x500] sm:$0xff] }
  0x20   :  { %819 = vmatprep.subr.bf16.mxu0 %v336_v20  ;;  %901 = vmatprep.subr.bf16.mxu1 %v338_v21  ;;  %v465_v11 = vunpack.c.h.s8.bf16 %v113_v3  ;;  %v480_v12 = vunpack.c.l.s8.bf16 %v128_v8  ;;  %v482_v13 = vunpack.c.l.s8.bf16 %v130_v9  ;;  %v479_v16 = vunpack.c.l.s8.bf16 %v127_v14  ;;  %v144_v20 = vld [vmem:[#allocation2 + $0x388] sm:$0xff]  ;;  %v146_v21 = vld [vmem:[#allocation2 + $0x398] sm:$0xff]  ;;  %v193_v3 = vld [vmem:[#allocation2 + $0x510] sm:$0xff] }
  0x21   :  { %v481_v17 = vunpack.c.l.s8.bf16 %v129_v15  ;;  %v496_v18 = vunpack.c.h.s8.bf16 %v128_v8  ;;  %v498_v19 = vunpack.c.h.s8.bf16 %v130_v9  ;;  %v495_v22 = vunpack.c.h.s8.bf16 %v127_v14  ;;  %v208_v8 = vld [vmem:[#allocation2 + $0x588] sm:$0xff]  ;;  %v210_v9 = vld [vmem:[#allocation2 + $0x598] sm:$0xff]  ;;  %v207_v14 = vld [vmem:[#allocation2 + $0x580] sm:$0xff] }
  0x22   :  { %v497_v23 = vunpack.c.h.s8.bf16 %v129_v15  ;;  %v1837_v42 = vcombine.low %v1827_v30, %v1827_v30  ;;  %v209_v15 = vld [vmem:[#allocation2 + $0x590] sm:$0xff] }
  0x23   :  { %820 = vmatpush1.bf16.msra.mxu0 %v335_v24  ;;  %902 = vmatpush1.bf16.msra.mxu1 %v337_v25  ;;  %v512_v24 = vunpack.c.l.s8.bf16 %v144_v20  ;;  %v514_v25 = vunpack.c.l.s8.bf16 %v146_v21 }
  0x24   :  { %821 = vmatprep.subr.bf16.mxu0 %v352_v26  ;;  %903 = vmatprep.subr.bf16.mxu1 %v354_v27  ;;  %v143_v26 = vld [vmem:[#allocation2 + $0x380] sm:$0xff]  ;;  %v145_v27 = vld [vmem:[#allocation2 + $0x390] sm:$0xff] }
  0x25   :  { %v511_v28 = vunpack.c.l.s8.bf16 %v143_v26  ;;  %v513_v29 = vunpack.c.l.s8.bf16 %v145_v27  ;;  %v527_v36 = vunpack.c.h.s8.bf16 %v143_v26  ;;  %v529_v37 = vunpack.c.h.s8.bf16 %v145_v27  ;;  %v223_v26 = vld [vmem:[#allocation2 + $0x600] sm:$0xff]  ;;  %v225_v27 = vld [vmem:[#allocation2 + $0x610] sm:$0xff] }
  0x27   :  { %822 = vmatpush1.bf16.msra.mxu0 %v351_v31  ;;  %904 = vmatpush1.bf16.msra.mxu1 %v353_v32  ;;  %v528_v31 = vunpack.c.h.s8.bf16 %v144_v20  ;;  %v530_v32 = vunpack.c.h.s8.bf16 %v146_v21  ;;  %v224_v20 = vld [vmem:[#allocation2 + $0x608] sm:$0xff]  ;;  %v226_v21 = vld [vmem:[#allocation2 + $0x618] sm:$0xff] }
  0x28   :  { %823 = vmatprep.subr.bf16.mxu0 %v368_v33  ;;  %905 = vmatprep.subr.bf16.mxu1 %v370_v34  ;;  %v160_v33 = vld [vmem:[#allocation2 + $0x408] sm:$0xff]  ;;  %v162_v34 = vld [vmem:[#allocation2 + $0x418] sm:$0xff] }
  0x2b   :  { %824 = vmatpush1.bf16.msra.mxu0 %v367_v38  ;;  %906 = vmatpush1.bf16.msra.mxu1 %v369_v39  ;;  %v544_v38 = vunpack.c.l.s8.bf16 %v160_v33  ;;  %v546_v39 = vunpack.c.l.s8.bf16 %v162_v34 }
  0x2c   :  { %825 = vmatprep.subr.bf16.mxu0 %v384_v40  ;;  %907 = vmatprep.subr.bf16.mxu1 %v386_v41  ;;  %v159_v40 = vld [vmem:[#allocation2 + $0x400] sm:$0xff]  ;;  %v161_v41 = vld [vmem:[#allocation2 + $0x410] sm:$0xff] }
  0x2d   :  { %v559_v30 = vunpack.c.h.s8.bf16 %v159_v40 }
  0x2f   :  { %826 = vmatpush1.bf16.msra.mxu0 %v383_v44  ;;  %908 = vmatpush1.bf16.msra.mxu1 %v385_v45  ;;  %v543_v44 = vunpack.c.l.s8.bf16 %v159_v40  ;;  %v545_v45 = vunpack.c.l.s8.bf16 %v161_v41  ;;  %v239_v40 = vld [vmem:[#allocation2 + $0x680] sm:$0xff] }
  0x30   :  { %827 = vmatprep.subr.bf16.mxu0 %v400_v46  ;;  %909 = vmatprep.subr.bf16.mxu1 %v402_v47  ;;  %v560_v46 = vunpack.c.h.s8.bf16 %v160_v33  ;;  %v562_v47 = vunpack.c.h.s8.bf16 %v162_v34  ;;  %v240_v33 = vld [vmem:[#allocation2 + $0x688] sm:$0xff]  ;;  %v242_v34 = vld [vmem:[#allocation2 + $0x698] sm:$0xff] }
  0x33   :  { %828 = vmatpush1.bf16.msra.mxu0 %v399_v50  ;;  %910 = vmatpush1.bf16.msra.mxu1 %v401_v51  ;;  %v1846_v50 = vcombine.high %v1842_v43, %v1842_v43  ;;  %v561_v51 = vunpack.c.h.s8.bf16 %v161_v41  ;;  %v241_v41 = vld [vmem:[#allocation2 + $0x690] sm:$0xff] }
  0x34   :  { %829 = vmatprep.subr.bf16.mxu0 %v416_v52  ;;  %911 = vmatprep.subr.bf16.mxu1 %v418_v53  ;;  %v576_v52 = vunpack.c.l.s8.bf16 %v176_v48  ;;  %v578_v53 = vunpack.c.l.s8.bf16 %v178_v49 }
  0x37   :  { %830 = vmatpush1.bf16.msra.mxu0 %v415_v56  ;;  %912 = vmatpush1.bf16.msra.mxu1 %v417_v57  ;;  %v575_v56 = vunpack.c.l.s8.bf16 %v175_v54  ;;  %v577_v57 = vunpack.c.l.s8.bf16 %v177_v55 }
  0x38   :  { %831 = vmatprep.subr.bf16.mxu0 %v432_v58  ;;  %913 = vmatprep.subr.bf16.mxu1 %v434_v59  ;;  %v592_v58 = vunpack.c.h.s8.bf16 %v176_v48  ;;  %v594_v59 = vunpack.c.h.s8.bf16 %v178_v49  ;;  %v256_v48 = vld [vmem:[#allocation2 + $0x708] sm:$0xff]  ;;  %v258_v49 = vld [vmem:[#allocation2 + $0x718] sm:$0xff] }
  0x3b   :  { %832 = vmatpush1.bf16.msra.mxu0 %v431_v62  ;;  %914 = vmatpush1.bf16.msra.mxu1 %v433_v63  ;;  %v591_v62 = vunpack.c.h.s8.bf16 %v175_v54  ;;  %v593_v63 = vunpack.c.h.s8.bf16 %v177_v55  ;;  %v255_v54 = vld [vmem:[#allocation2 + $0x700] sm:$0xff]  ;;  %v257_v55 = vld [vmem:[#allocation2 + $0x710] sm:$0xff] }
  0x3c   :  { %833 = vmatprep.subr.bf16.mxu0 %v448_v0  ;;  %915 = vmatprep.subr.bf16.mxu1 %v450_v1  ;;  %v608_v0 = vunpack.c.l.s8.bf16 %v192_v60  ;;  %v610_v1 = vunpack.c.l.s8.bf16 %v194_v61 }
  0x3f   :  { %834 = vmatpush1.bf16.msra.mxu0 %v447_v4  ;;  %916 = vmatpush1.bf16.msra.mxu1 %v449_v5  ;;  %v607_v4 = vunpack.c.l.s8.bf16 %v191_v2  ;;  %v609_v5 = vunpack.c.l.s8.bf16 %v193_v3 }
  0x40   :  { %835 = vmatprep.subr.bf16.mxu0 %v464_v6  ;;  %917 = vmatprep.subr.bf16.mxu1 %v466_v7  ;;  %v624_v6 = vunpack.c.h.s8.bf16 %v192_v60  ;;  %v626_v7 = vunpack.c.h.s8.bf16 %v194_v61  ;;  %v272_v60 = vld [vmem:[#allocation2 + $0x788] sm:$0xff]  ;;  %v274_v61 = vld [vmem:[#allocation2 + $0x798] sm:$0xff] }
  0x43   :  { %836 = vmatpush1.bf16.msra.mxu0 %v463_v10  ;;  %918 = vmatpush1.bf16.msra.mxu1 %v465_v11  ;;  %v623_v10 = vunpack.c.h.s8.bf16 %v191_v2  ;;  %v625_v11 = vunpack.c.h.s8.bf16 %v193_v3  ;;  %v271_v2 = vld [vmem:[#allocation2 + $0x780] sm:$0xff]  ;;  %v273_v3 = vld [vmem:[#allocation2 + $0x790] sm:$0xff] }
  0x44   :  { %837 = vmatprep.subr.bf16.mxu0 %v480_v12  ;;  %919 = vmatprep.subr.bf16.mxu1 %v482_v13  ;;  %v640_v12 = vunpack.c.l.s8.bf16 %v208_v8  ;;  %v642_v13 = vunpack.c.l.s8.bf16 %v210_v9 }
  0x47   :  { %838 = vmatpush1.bf16.msra.mxu0 %v479_v16  ;;  %920 = vmatpush1.bf16.msra.mxu1 %v481_v17  ;;  %v639_v16 = vunpack.c.l.s8.bf16 %v207_v14  ;;  %v641_v17 = vunpack.c.l.s8.bf16 %v209_v15 }
  0x48   :  { %839 = vmatprep.subr.bf16.mxu0 %v496_v18  ;;  %921 = vmatprep.subr.bf16.mxu1 %v498_v19  ;;  %v656_v18 = vunpack.c.h.s8.bf16 %v208_v8  ;;  %v658_v19 = vunpack.c.h.s8.bf16 %v210_v9  ;;  %v36_v8 = vld [vmem:[#allocation2 + $0x28] sm:$0xff]  ;;  %v38_v9 = vld [vmem:[#allocation2 + $0x38] sm:$0xff] }
  0x4b   :  { %840 = vmatpush1.bf16.msra.mxu0 %v495_v22  ;;  %922 = vmatpush1.bf16.msra.mxu1 %v497_v23  ;;  %v655_v22 = vunpack.c.h.s8.bf16 %v207_v14  ;;  %v657_v23 = vunpack.c.h.s8.bf16 %v209_v15  ;;  %v35_v14 = vld [vmem:[#allocation2 + $0x20] sm:$0xff]  ;;  %v37_v15 = vld [vmem:[#allocation2 + $0x30] sm:$0xff] }
  0x4c   :  { %841 = vmatprep.subr.bf16.mxu0 %v512_v24  ;;  %923 = vmatprep.subr.bf16.mxu1 %v514_v25  ;;  %v672_v24 = vunpack.c.l.s8.bf16 %v224_v20  ;;  %v674_v25 = vunpack.c.l.s8.bf16 %v226_v21 }
  0x4f   :  { %842 = vmatpush1.bf16.msra.mxu0 %v511_v28  ;;  %924 = vmatpush1.bf16.msra.mxu1 %v513_v29  ;;  %v671_v28 = vunpack.c.l.s8.bf16 %v223_v26  ;;  %v673_v29 = vunpack.c.l.s8.bf16 %v225_v27 }
  0x50   :  { %843 = vmatprep.subr.bf16.mxu0 %v528_v31  ;;  %925 = vmatprep.subr.bf16.mxu1 %v530_v32  ;;  %v688_v31 = vunpack.c.h.s8.bf16 %v224_v20  ;;  %v690_v32 = vunpack.c.h.s8.bf16 %v226_v21  ;;  %v310_v20 = vunpack.c.h.s8.bf16 %v38_v9  ;;  %v52_v21 = vld [vmem:[#allocation2 + $0xa8] sm:$0xff] }
  0x53   :  { %844 = vmatpush1.bf16.msra.mxu0 %v527_v36  ;;  %926 = vmatpush1.bf16.msra.mxu1 %v529_v37  ;;  %v687_v36 = vunpack.c.h.s8.bf16 %v223_v26  ;;  %v689_v37 = vunpack.c.h.s8.bf16 %v225_v27  ;;  %v51_v26 = vld [vmem:[#allocation2 + $0xa0] sm:$0xff]  ;;  %v53_v27 = vld [vmem:[#allocation2 + $0xb0] sm:$0xff] }
  0x54   :  { %854 = vmatprep.subr.bf16.mxu0 %v544_v38  ;;  %936 = vmatprep.subr.bf16.mxu1 %v546_v39  ;;  %v704_v38 = vunpack.c.l.s8.bf16 %v240_v33  ;;  %v706_v39 = vunpack.c.l.s8.bf16 %v242_v34 }
  0x56   :  { %846 = vmatmul.mubr.bf16.vlgmr.msra.gmra.mrb[0].mxu0 %v1837_v42  ;;  %928 = vmatmul.mubr.bf16.vlgmr.msra.gmra.mrb[0].mxu1 %v1837_v42 }
  0x57   :  { %855 = vmatpush1.bf16.msra.mxu0 %v543_v44  ;;  %937 = vmatpush1.bf16.msra.mxu1 %v545_v45  ;;  %v703_v44 = vunpack.c.l.s8.bf16 %v239_v40  ;;  %v705_v45 = vunpack.c.l.s8.bf16 %v241_v41 }
  0x58   :  { %856 = vmatprep.subr.bf16.mxu0 %v560_v46  ;;  %938 = vmatprep.subr.bf16.mxu1 %v562_v47  ;;  %v720_v46 = vunpack.c.h.s8.bf16 %v240_v33  ;;  %v722_v47 = vunpack.c.h.s8.bf16 %v242_v34  ;;  %v68_v33 = vld [vmem:[#allocation2 + $0x128] sm:$0xff]  ;;  %v70_v34 = vld [vmem:[#allocation2 + $0x138] sm:$0xff] }
  0x59   :  { %886 = vmatprep.mubr.bf16.mxu0 %v1846_v50  ;;  %968 = vmatprep.mubr.bf16.mxu1 %v1846_v50 }
  0x5b   :  { %857 = vmatpush1.bf16.msra.mxu0 %v559_v30  ;;  %939 = vmatpush1.bf16.msra.mxu1 %v561_v51  ;;  %v719_v30 = vunpack.c.h.s8.bf16 %v239_v40  ;;  %v721_v51 = vunpack.c.h.s8.bf16 %v241_v41  ;;  %v67_v40 = vld [vmem:[#allocation2 + $0x120] sm:$0xff]  ;;  %v69_v41 = vld [vmem:[#allocation2 + $0x130] sm:$0xff] }
  0x5c   :  { %858 = vmatprep.subr.bf16.mxu0 %v576_v52  ;;  %940 = vmatprep.subr.bf16.mxu1 %v578_v53  ;;  %v736_v52 = vunpack.c.l.s8.bf16 %v256_v48  ;;  %v738_v53 = vunpack.c.l.s8.bf16 %v258_v49 }
  0x5f   :  { %859 = vmatpush1.bf16.msra.mxu0 %v575_v56  ;;  %941 = vmatpush1.bf16.msra.mxu1 %v577_v57  ;;  %v735_v56 = vunpack.c.l.s8.bf16 %v255_v54  ;;  %v737_v57 = vunpack.c.l.s8.bf16 %v257_v55 }
  0x60   :  { %860 = vmatprep.subr.bf16.mxu0 %v592_v58  ;;  %942 = vmatprep.subr.bf16.mxu1 %v594_v59  ;;  %v752_v58 = vunpack.c.h.s8.bf16 %v256_v48  ;;  %v754_v59 = vunpack.c.h.s8.bf16 %v258_v49  ;;  %v84_v48 = vld [vmem:[#allocation2 + $0x1a8] sm:$0xff]  ;;  %v86_v49 = vld [vmem:[#allocation2 + $0x1b8] sm:$0xff] }
  0x63   :  { %861 = vmatpush1.bf16.msra.mxu0 %v591_v62  ;;  %943 = vmatpush1.bf16.msra.mxu1 %v593_v63  ;;  %v751_v62 = vunpack.c.h.s8.bf16 %v255_v54  ;;  %v753_v63 = vunpack.c.h.s8.bf16 %v257_v55  ;;  %v83_v54 = vld [vmem:[#allocation2 + $0x1a0] sm:$0xff]  ;;  %v85_v55 = vld [vmem:[#allocation2 + $0x1b0] sm:$0xff] }
  0x64   :  { %862 = vmatprep.subr.bf16.mxu0 %v608_v0  ;;  %944 = vmatprep.subr.bf16.mxu1 %v610_v1  ;;  %v768_v0 = vunpack.c.l.s8.bf16 %v272_v60  ;;  %v770_v1 = vunpack.c.l.s8.bf16 %v274_v61 }
  0x67   :  { %863 = vmatpush1.bf16.msra.mxu0 %v607_v4  ;;  %945 = vmatpush1.bf16.msra.mxu1 %v609_v5  ;;  %v767_v4 = vunpack.c.l.s8.bf16 %v271_v2  ;;  %v769_v5 = vunpack.c.l.s8.bf16 %v273_v3 }
  0x68   :  { %864 = vmatprep.subr.bf16.mxu0 %v624_v6  ;;  %946 = vmatprep.subr.bf16.mxu1 %v626_v7  ;;  %v784_v6 = vunpack.c.h.s8.bf16 %v272_v60  ;;  %v786_v7 = vunpack.c.h.s8.bf16 %v274_v61  ;;  %v100_v60 = vld [vmem:[#allocation2 + $0x228] sm:$0xff]  ;;  %v102_v61 = vld [vmem:[#allocation2 + $0x238] sm:$0xff] }
  0x6b   :  { %865 = vmatpush1.bf16.msra.mxu0 %v623_v10  ;;  %947 = vmatpush1.bf16.msra.mxu1 %v625_v11  ;;  %v783_v10 = vunpack.c.h.s8.bf16 %v271_v2  ;;  %v785_v11 = vunpack.c.h.s8.bf16 %v273_v3  ;;  %v99_v2 = vld [vmem:[#allocation2 + $0x220] sm:$0xff]  ;;  %v101_v3 = vld [vmem:[#allocation2 + $0x230] sm:$0xff] }
  0x6c   :  { %866 = vmatprep.subr.bf16.mxu0 %v640_v12  ;;  %948 = vmatprep.subr.bf16.mxu1 %v642_v13  ;;  %v292_v12 = vunpack.c.l.s8.bf16 %v36_v8  ;;  %v294_v13 = vunpack.c.l.s8.bf16 %v38_v9  ;;  %v118_v9 = vld [vmem:[#allocation2 + $0x2b8] sm:$0xff] }
  0x6f   :  { %867 = vmatpush1.bf16.msra.mxu0 %v639_v16  ;;  %949 = vmatpush1.bf16.msra.mxu1 %v641_v17  ;;  %v1854_v16 = vcombine.low %v1842_v43, %v1842_v43  ;;  %v291_v17 = vunpack.c.l.s8.bf16 %v35_v14  ;;  %v324_v43 = vunpack.c.l.s8.bf16 %v52_v21 }
  0x70   :  { %868 = vmatprep.subr.bf16.mxu0 %v656_v18  ;;  %950 = vmatprep.subr.bf16.mxu1 %v658_v19  ;;  %v293_v18 = vunpack.c.l.s8.bf16 %v37_v15  ;;  %v308_v19 = vunpack.c.h.s8.bf16 %v36_v8  ;;  %v116_v8 = vld [vmem:[#allocation2 + $0x2a8] sm:$0xff] }
  0x73   :  { %869 = vmatpush1.bf16.msra.mxu0 %v655_v22  ;;  %951 = vmatpush1.bf16.msra.mxu1 %v657_v23  ;;  %v54_v22 = vld [vmem:[#allocation2 + $0xb8] sm:$0xff]  ;;  %v307_v23 = vunpack.c.h.s8.bf16 %v35_v14  ;;  %v115_v14 = vld [vmem:[#allocation2 + $0x2a0] sm:$0xff] }
  0x74   :  { %870 = vmatprep.subr.bf16.mxu0 %v672_v24  ;;  %952 = vmatprep.subr.bf16.mxu1 %v674_v25  ;;  %v309_v24 = vunpack.c.h.s8.bf16 %v37_v15  ;;  %v326_v25 = vunpack.c.l.s8.bf16 %v54_v22  ;;  %v117_v15 = vld [vmem:[#allocation2 + $0x2b0] sm:$0xff] }
  0x77   :  { %871 = vmatpush1.bf16.msra.mxu0 %v671_v28  ;;  %953 = vmatpush1.bf16.msra.mxu1 %v673_v29  ;;  %v323_v28 = vunpack.c.l.s8.bf16 %v51_v26  ;;  %v325_v29 = vunpack.c.l.s8.bf16 %v53_v27 }
  0x78   :  { %872 = vmatprep.subr.bf16.mxu0 %v688_v31  ;;  %954 = vmatprep.subr.bf16.mxu1 %v690_v32  ;;  %v340_v31 = vunpack.c.h.s8.bf16 %v52_v21  ;;  %v342_v32 = vunpack.c.h.s8.bf16 %v54_v22  ;;  %v132_v21 = vld [vmem:[#allocation2 + $0x328] sm:$0xff]  ;;  %v134_v22 = vld [vmem:[#allocation2 + $0x338] sm:$0xff] }
  0x7b   :  { %873 = vmatpush1.bf16.msra.mxu0 %v687_v36  ;;  %955 = vmatpush1.bf16.msra.mxu1 %v689_v37  ;;  %v339_v36 = vunpack.c.h.s8.bf16 %v51_v26  ;;  %v341_v37 = vunpack.c.h.s8.bf16 %v53_v27  ;;  %v131_v26 = vld [vmem:[#allocation2 + $0x320] sm:$0xff]  ;;  %v133_v27 = vld [vmem:[#allocation2 + $0x330] sm:$0xff] }
  0x7c   :  { %874 = vmatprep.subr.bf16.mxu0 %v704_v38  ;;  %956 = vmatprep.subr.bf16.mxu1 %v706_v39  ;;  %v356_v38 = vunpack.c.l.s8.bf16 %v68_v33  ;;  %v358_v39 = vunpack.c.l.s8.bf16 %v70_v34 }
  0x7f   :  { %875 = vmatpush1.bf16.msra.mxu0 %v703_v44  ;;  %957 = vmatpush1.bf16.msra.mxu1 %v705_v45  ;;  %v355_v44 = vunpack.c.l.s8.bf16 %v67_v40  ;;  %v357_v45 = vunpack.c.l.s8.bf16 %v69_v41 }
  0x80   :  { %876 = vmatprep.subr.bf16.mxu0 %v720_v46  ;;  %958 = vmatprep.subr.bf16.mxu1 %v722_v47  ;;  %v372_v46 = vunpack.c.h.s8.bf16 %v68_v33  ;;  %v374_v47 = vunpack.c.h.s8.bf16 %v70_v34  ;;  %v148_v33 = vld [vmem:[#allocation2 + $0x3a8] sm:$0xff]  ;;  %v150_v34 = vld [vmem:[#allocation2 + $0x3b8] sm:$0xff] }
  0x83   :  { %877 = vmatpush1.bf16.msra.mxu0 %v719_v30  ;;  %959 = vmatpush1.bf16.msra.mxu1 %v721_v51  ;;  %v371_v30 = vunpack.c.h.s8.bf16 %v67_v40  ;;  %v373_v51 = vunpack.c.h.s8.bf16 %v69_v41  ;;  %v147_v40 = vld [vmem:[#allocation2 + $0x3a0] sm:$0xff]  ;;  %v149_v41 = vld [vmem:[#allocation2 + $0x3b0] sm:$0xff] }
  0x84   :  { %878 = vmatprep.subr.bf16.mxu0 %v736_v52  ;;  %960 = vmatprep.subr.bf16.mxu1 %v738_v53  ;;  %v388_v52 = vunpack.c.l.s8.bf16 %v84_v48  ;;  %v390_v53 = vunpack.c.l.s8.bf16 %v86_v49 }
  0x87   :  { %879 = vmatpush1.bf16.msra.mxu0 %v735_v56  ;;  %961 = vmatpush1.bf16.msra.mxu1 %v737_v57  ;;  %v387_v56 = vunpack.c.l.s8.bf16 %v83_v54  ;;  %v389_v57 = vunpack.c.l.s8.bf16 %v85_v55 }
  0x88   :  { %880 = vmatprep.subr.bf16.mxu0 %v752_v58  ;;  %962 = vmatprep.subr.bf16.mxu1 %v754_v59  ;;  %v404_v58 = vunpack.c.h.s8.bf16 %v84_v48  ;;  %v406_v59 = vunpack.c.h.s8.bf16 %v86_v49  ;;  %v164_v48 = vld [vmem:[#allocation2 + $0x428] sm:$0xff]  ;;  %v166_v49 = vld [vmem:[#allocation2 + $0x438] sm:$0xff] }
  0x8b   :  { %881 = vmatpush1.bf16.msra.mxu0 %v751_v62  ;;  %963 = vmatpush1.bf16.msra.mxu1 %v753_v63  ;;  %v403_v62 = vunpack.c.h.s8.bf16 %v83_v54  ;;  %v405_v63 = vunpack.c.h.s8.bf16 %v85_v55  ;;  %v163_v54 = vld [vmem:[#allocation2 + $0x420] sm:$0xff]  ;;  %v165_v55 = vld [vmem:[#allocation2 + $0x430] sm:$0xff] }
  0x8c   :  { %882 = vmatprep.subr.bf16.mxu0 %v768_v0  ;;  %964 = vmatprep.subr.bf16.mxu1 %v770_v1  ;;  %v420_v0 = vunpack.c.l.s8.bf16 %v100_v60  ;;  %v422_v1 = vunpack.c.l.s8.bf16 %v102_v61 }
  0x8f   :  { %883 = vmatpush1.bf16.msra.mxu0 %v767_v4  ;;  %965 = vmatpush1.bf16.msra.mxu1 %v769_v5  ;;  %v419_v4 = vunpack.c.l.s8.bf16 %v99_v2  ;;  %v421_v5 = vunpack.c.l.s8.bf16 %v101_v3 }
  0x90   :  { %884 = vmatprep.subr.bf16.mxu0 %v784_v6  ;;  %966 = vmatprep.subr.bf16.mxu1 %v786_v7  ;;  %v436_v6 = vunpack.c.h.s8.bf16 %v100_v60  ;;  %v438_v7 = vunpack.c.h.s8.bf16 %v102_v61  ;;  %v180_v60 = vld [vmem:[#allocation2 + $0x4a8] sm:$0xff]  ;;  %v182_v61 = vld [vmem:[#allocation2 + $0x4b8] sm:$0xff] }
  0x93   :  { %885 = vmatpush1.bf16.msra.mxu0 %v783_v10  ;;  %967 = vmatpush1.bf16.msra.mxu1 %v785_v11  ;;  %v435_v10 = vunpack.c.h.s8.bf16 %v99_v2  ;;  %v437_v11 = vunpack.c.h.s8.bf16 %v101_v3  ;;  %v179_v2 = vld [vmem:[#allocation2 + $0x4a0] sm:$0xff]  ;;  %v181_v3 = vld [vmem:[#allocation2 + $0x4b0] sm:$0xff] }
  0x94   :  { %977 = vmatprep.subr.bf16.mxu0 %v292_v12  ;;  %1059 = vmatprep.subr.bf16.mxu1 %v294_v13  ;;  %v452_v12 = vunpack.c.l.s8.bf16 %v116_v8  ;;  %v454_v13 = vunpack.c.l.s8.bf16 %v118_v9 }
  0x96   :  { %887 = vmatmul.mubr.bf16.vlgmr.msra.gmra.mrb[0].mxu0 %v1854_v16  ;;  %969 = vmatmul.mubr.bf16.vlgmr.msra.gmra.mrb[0].mxu1 %v1854_v16 }
  0x97   :  { %978 = vmatpush1.bf16.msra.mxu0 %v291_v17  ;;  %1060 = vmatpush1.bf16.msra.mxu1 %v293_v18  ;;  %v451_v17 = vunpack.c.l.s8.bf16 %v115_v14  ;;  %v453_v18 = vunpack.c.l.s8.bf16 %v117_v15 }
  0x98   :  { %979 = vmatprep.subr.bf16.mxu0 %v308_v19  ;;  %1061 = vmatprep.subr.bf16.mxu1 %v310_v20  ;;  %v468_v19 = vunpack.c.h.s8.bf16 %v116_v8  ;;  %v470_v20 = vunpack.c.h.s8.bf16 %v118_v9  ;;  %v196_v8 = vld [vmem:[#allocation2 + $0x528] sm:$0xff]  ;;  %v198_v9 = vld [vmem:[#allocation2 + $0x538] sm:$0xff] }
  0x99   :  { %1009 = vmatprep.mubr.bf16.mxu0 %v1831_v35  ;;  %1091 = vmatprep.mubr.bf16.mxu1 %v1831_v35 }
  0x9b   :  { %980 = vmatpush1.bf16.msra.mxu0 %v307_v23  ;;  %1062 = vmatpush1.bf16.msra.mxu1 %v309_v24  ;;  %v467_v23 = vunpack.c.h.s8.bf16 %v115_v14  ;;  %v469_v24 = vunpack.c.h.s8.bf16 %v117_v15  ;;  %v195_v14 = vld [vmem:[#allocation2 + $0x520] sm:$0xff]  ;;  %v197_v15 = vld [vmem:[#allocation2 + $0x530] sm:$0xff] }
  0x9c   :  { %981 = vmatprep.subr.bf16.mxu0 %v324_v43  ;;  %1063 = vmatprep.subr.bf16.mxu1 %v326_v25  ;;  %v484_v43 = vunpack.c.l.s8.bf16 %v132_v21  ;;  %v486_v25 = vunpack.c.l.s8.bf16 %v134_v22 }
  0x9f   :  { %982 = vmatpush1.bf16.msra.mxu0 %v323_v28  ;;  %1064 = vmatpush1.bf16.msra.mxu1 %v325_v29  ;;  %v483_v28 = vunpack.c.l.s8.bf16 %v131_v26  ;;  %v485_v29 = vunpack.c.l.s8.bf16 %v133_v27 }
  0xa0   :  { %983 = vmatprep.subr.bf16.mxu0 %v340_v31  ;;  %1065 = vmatprep.subr.bf16.mxu1 %v342_v32  ;;  %v500_v31 = vunpack.c.h.s8.bf16 %v132_v21  ;;  %v502_v32 = vunpack.c.h.s8.bf16 %v134_v22  ;;  %v212_v21 = vld [vmem:[#allocation2 + $0x5a8] sm:$0xff]  ;;  %v214_v22 = vld [vmem:[#allocation2 + $0x5b8] sm:$0xff] }
  0xa3   :  { %984 = vmatpush1.bf16.msra.mxu0 %v339_v36  ;;  %1066 = vmatpush1.bf16.msra.mxu1 %v341_v37  ;;  %v499_v36 = vunpack.c.h.s8.bf16 %v131_v26  ;;  %v501_v37 = vunpack.c.h.s8.bf16 %v133_v27  ;;  %v211_v26 = vld [vmem:[#allocation2 + $0x5a0] sm:$0xff]  ;;  %v213_v27 = vld [vmem:[#allocation2 + $0x5b0] sm:$0xff] }
  0xa4   :  { %985 = vmatprep.subr.bf16.mxu0 %v356_v38  ;;  %1067 = vmatprep.subr.bf16.mxu1 %v358_v39  ;;  %v516_v38 = vunpack.c.l.s8.bf16 %v148_v33  ;;  %v518_v39 = vunpack.c.l.s8.bf16 %v150_v34 }
  0xa7   :  { %986 = vmatpush1.bf16.msra.mxu0 %v355_v44  ;;  %1068 = vmatpush1.bf16.msra.mxu1 %v357_v45  ;;  %v515_v44 = vunpack.c.l.s8.bf16 %v147_v40  ;;  %v517_v45 = vunpack.c.l.s8.bf16 %v149_v41 }
  0xa8   :  { %987 = vmatprep.subr.bf16.mxu0 %v372_v46  ;;  %1069 = vmatprep.subr.bf16.mxu1 %v374_v47  ;;  %v532_v46 = vunpack.c.h.s8.bf16 %v148_v33  ;;  %v534_v47 = vunpack.c.h.s8.bf16 %v150_v34  ;;  %v228_v33 = vld [vmem:[#allocation2 + $0x628] sm:$0xff]  ;;  %v230_v34 = vld [vmem:[#allocation2 + $0x638] sm:$0xff] }
  0xab   :  { %988 = vmatpush1.bf16.msra.mxu0 %v371_v30  ;;  %1070 = vmatpush1.bf16.msra.mxu1 %v373_v51  ;;  %v531_v30 = vunpack.c.h.s8.bf16 %v147_v40  ;;  %v533_v51 = vunpack.c.h.s8.bf16 %v149_v41  ;;  %v227_v40 = vld [vmem:[#allocation2 + $0x620] sm:$0xff]  ;;  %v229_v41 = vld [vmem:[#allocation2 + $0x630] sm:$0xff] }
  0xac   :  { %989 = vmatprep.subr.bf16.mxu0 %v388_v52  ;;  %1071 = vmatprep.subr.bf16.mxu1 %v390_v53  ;;  %v548_v52 = vunpack.c.l.s8.bf16 %v164_v48  ;;  %v550_v53 = vunpack.c.l.s8.bf16 %v166_v49 }
  0xaf   :  { %990 = vmatpush1.bf16.msra.mxu0 %v387_v56  ;;  %1072 = vmatpush1.bf16.msra.mxu1 %v389_v57  ;;  %v547_v56 = vunpack.c.l.s8.bf16 %v163_v54  ;;  %v549_v57 = vunpack.c.l.s8.bf16 %v165_v55 }
  0xb0   :  { %991 = vmatprep.subr.bf16.mxu0 %v404_v58  ;;  %1073 = vmatprep.subr.bf16.mxu1 %v406_v59  ;;  %v564_v58 = vunpack.c.h.s8.bf16 %v164_v48  ;;  %v566_v59 = vunpack.c.h.s8.bf16 %v166_v49  ;;  %v244_v48 = vld [vmem:[#allocation2 + $0x6a8] sm:$0xff]  ;;  %v246_v49 = vld [vmem:[#allocation2 + $0x6b8] sm:$0xff] }
  0xb3   :  { %992 = vmatpush1.bf16.msra.mxu0 %v403_v62  ;;  %1074 = vmatpush1.bf16.msra.mxu1 %v405_v63  ;;  %v563_v62 = vunpack.c.h.s8.bf16 %v163_v54  ;;  %v565_v63 = vunpack.c.h.s8.bf16 %v165_v55  ;;  %v243_v54 = vld [vmem:[#allocation2 + $0x6a0] sm:$0xff]  ;;  %v245_v55 = vld [vmem:[#allocation2 + $0x6b0] sm:$0xff] }
  0xb4   :  { %993 = vmatprep.subr.bf16.mxu0 %v420_v0  ;;  %1075 = vmatprep.subr.bf16.mxu1 %v422_v1  ;;  %v580_v0 = vunpack.c.l.s8.bf16 %v180_v60  ;;  %v582_v1 = vunpack.c.l.s8.bf16 %v182_v61 }
  0xb7   :  { %994 = vmatpush1.bf16.msra.mxu0 %v419_v4  ;;  %1076 = vmatpush1.bf16.msra.mxu1 %v421_v5  ;;  %v579_v4 = vunpack.c.l.s8.bf16 %v179_v2  ;;  %v581_v5 = vunpack.c.l.s8.bf16 %v181_v3 }
  0xb8   :  { %995 = vmatprep.subr.bf16.mxu0 %v436_v6  ;;  %1077 = vmatprep.subr.bf16.mxu1 %v438_v7  ;;  %v596_v6 = vunpack.c.h.s8.bf16 %v180_v60  ;;  %v598_v7 = vunpack.c.h.s8.bf16 %v182_v61  ;;  %v260_v60 = vld [vmem:[#allocation2 + $0x728] sm:$0xff]  ;;  %v262_v61 = vld [vmem:[#allocation2 + $0x738] sm:$0xff] }
  0xbb   :  { %996 = vmatpush1.bf16.msra.mxu0 %v435_v10  ;;  %1078 = vmatpush1.bf16.msra.mxu1 %v437_v11  ;;  %v595_v10 = vunpack.c.h.s8.bf16 %v179_v2  ;;  %v597_v11 = vunpack.c.h.s8.bf16 %v181_v3  ;;  %v259_v2 = vld [vmem:[#allocation2 + $0x720] sm:$0xff]  ;;  %v261_v3 = vld [vmem:[#allocation2 + $0x730] sm:$0xff] }
  0xbc   :  { %997 = vmatprep.subr.bf16.mxu0 %v452_v12  ;;  %1079 = vmatprep.subr.bf16.mxu1 %v454_v13  ;;  %v612_v12 = vunpack.c.l.s8.bf16 %v196_v8  ;;  %v614_v13 = vunpack.c.l.s8.bf16 %v198_v9 }
  0xbf   :  { %998 = vmatpush1.bf16.msra.mxu0 %v451_v17  ;;  %1080 = vmatpush1.bf16.msra.mxu1 %v453_v18  ;;  %v611_v17 = vunpack.c.l.s8.bf16 %v195_v14  ;;  %v613_v18 = vunpack.c.l.s8.bf16 %v197_v15 }
  0xc0   :  { %999 = vmatprep.subr.bf16.mxu0 %v468_v19  ;;  %1081 = vmatprep.subr.bf16.mxu1 %v470_v20  ;;  %v628_v19 = vunpack.c.h.s8.bf16 %v196_v8  ;;  %v630_v20 = vunpack.c.h.s8.bf16 %v198_v9  ;;  %v276_v8 = vld [vmem:[#allocation2 + $0x7a8] sm:$0xff]  ;;  %v278_v9 = vld [vmem:[#allocation2 + $0x7b8] sm:$0xff] }
  0xc3   :  { %1000 = vmatpush1.bf16.msra.mxu0 %v467_v23  ;;  %1082 = vmatpush1.bf16.msra.mxu1 %v469_v24  ;;  %v627_v23 = vunpack.c.h.s8.bf16 %v195_v14  ;;  %v629_v24 = vunpack.c.h.s8.bf16 %v197_v15  ;;  %v275_v14 = vld [vmem:[#allocation2 + $0x7a0] sm:$0xff]  ;;  %v277_v15 = vld [vmem:[#allocation2 + $0x7b0] sm:$0xff] }
  0xc4   :  { %1001 = vmatprep.subr.bf16.mxu0 %v484_v43  ;;  %1083 = vmatprep.subr.bf16.mxu1 %v486_v25  ;;  %v644_v43 = vunpack.c.l.s8.bf16 %v212_v21  ;;  %v646_v25 = vunpack.c.l.s8.bf16 %v214_v22 }
  0xc7   :  { %1002 = vmatpush1.bf16.msra.mxu0 %v483_v28  ;;  %1084 = vmatpush1.bf16.msra.mxu1 %v485_v29  ;;  %v643_v28 = vunpack.c.l.s8.bf16 %v211_v26  ;;  %v645_v29 = vunpack.c.l.s8.bf16 %v213_v27 }
  0xc8   :  { %1003 = vmatprep.subr.bf16.mxu0 %v500_v31  ;;  %1085 = vmatprep.subr.bf16.mxu1 %v502_v32  ;;  %v660_v31 = vunpack.c.h.s8.bf16 %v212_v21  ;;  %v662_v32 = vunpack.c.h.s8.bf16 %v214_v22  ;;  %v40_v21 = vld [vmem:[#allocation2 + $0x48] sm:$0xff]  ;;  %v42_v22 = vld [vmem:[#allocation2 + $0x58] sm:$0xff] }
  0xcb   :  { %1004 = vmatpush1.bf16.msra.mxu0 %v499_v36  ;;  %1086 = vmatpush1.bf16.msra.mxu1 %v501_v37  ;;  %v659_v36 = vunpack.c.h.s8.bf16 %v211_v26  ;;  %v661_v37 = vunpack.c.h.s8.bf16 %v213_v27  ;;  %v39_v26 = vld [vmem:[#allocation2 + $0x40] sm:$0xff]  ;;  %v41_v27 = vld [vmem:[#allocation2 + $0x50] sm:$0xff] }
  0xcc   :  { %1005 = vmatprep.subr.bf16.mxu0 %v516_v38  ;;  %1087 = vmatprep.subr.bf16.mxu1 %v518_v39  ;;  %v676_v38 = vunpack.c.l.s8.bf16 %v228_v33  ;;  %v678_v39 = vunpack.c.l.s8.bf16 %v230_v34 }
  0xcf   :  { %1006 = vmatpush1.bf16.msra.mxu0 %v515_v44  ;;  %1088 = vmatpush1.bf16.msra.mxu1 %v517_v45  ;;  %v675_v44 = vunpack.c.l.s8.bf16 %v227_v40  ;;  %v677_v45 = vunpack.c.l.s8.bf16 %v229_v41 }
  0xd0   :  { %1007 = vmatprep.subr.bf16.mxu0 %v532_v46  ;;  %1089 = vmatprep.subr.bf16.mxu1 %v534_v47  ;;  %v692_v46 = vunpack.c.h.s8.bf16 %v228_v33  ;;  %v694_v47 = vunpack.c.h.s8.bf16 %v230_v34  ;;  %v56_v33 = vld [vmem:[#allocation2 + $0xc8] sm:$0xff]  ;;  %v58_v34 = vld [vmem:[#allocation2 + $0xd8] sm:$0xff] }
  0xd3   :  { %1008 = vmatpush1.bf16.msra.mxu0 %v531_v30  ;;  %1090 = vmatpush1.bf16.msra.mxu1 %v533_v51  ;;  %v691_v30 = vunpack.c.h.s8.bf16 %v227_v40  ;;  %v693_v51 = vunpack.c.h.s8.bf16 %v229_v41  ;;  %v55_v40 = vld [vmem:[#allocation2 + $0xc0] sm:$0xff]  ;;  %v57_v41 = vld [vmem:[#allocation2 + $0xd0] sm:$0xff] }
  0xd4   :  { %1018 = vmatprep.subr.bf16.mxu0 %v548_v52  ;;  %1100 = vmatprep.subr.bf16.mxu1 %v550_v53  ;;  %v708_v52 = vunpack.c.l.s8.bf16 %v244_v48  ;;  %v710_v53 = vunpack.c.l.s8.bf16 %v246_v49 }
  0xd6   :  { %1010 = vmatmul.mubr.bf16.vlgmr.msra.gmra.mrb[4].mxu0 %v1837_v42  ;;  %1092 = vmatmul.mubr.bf16.vlgmr.msra.gmra.mrb[4].mxu1 %v1837_v42 }
  0xd7   :  { %1019 = vmatpush1.bf16.msra.mxu0 %v547_v56  ;;  %1101 = vmatpush1.bf16.msra.mxu1 %v549_v57  ;;  %v707_v56 = vunpack.c.l.s8.bf16 %v243_v54  ;;  %v709_v57 = vunpack.c.l.s8.bf16 %v245_v55 }
  0xd8   :  { %1020 = vmatprep.subr.bf16.mxu0 %v564_v58  ;;  %1102 = vmatprep.subr.bf16.mxu1 %v566_v59  ;;  %v724_v58 = vunpack.c.h.s8.bf16 %v244_v48  ;;  %v726_v59 = vunpack.c.h.s8.bf16 %v246_v49  ;;  %v72_v48 = vld [vmem:[#allocation2 + $0x148] sm:$0xff]  ;;  %v74_v49 = vld [vmem:[#allocation2 + $0x158] sm:$0xff] }
  0xd9   :  { %1050 = vmatprep.mubr.bf16.mxu0 %v1846_v50  ;;  %1132 = vmatprep.mubr.bf16.mxu1 %v1846_v50 }
  0xdb   :  { %1021 = vmatpush1.bf16.msra.mxu0 %v563_v62  ;;  %1103 = vmatpush1.bf16.msra.mxu1 %v565_v63  ;;  %v723_v62 = vunpack.c.h.s8.bf16 %v243_v54  ;;  %v725_v63 = vunpack.c.h.s8.bf16 %v245_v55  ;;  %v71_v54 = vld [vmem:[#allocation2 + $0x140] sm:$0xff]  ;;  %v73_v55 = vld [vmem:[#allocation2 + $0x150] sm:$0xff] }
  0xdc   :  { %1022 = vmatprep.subr.bf16.mxu0 %v580_v0  ;;  %1104 = vmatprep.subr.bf16.mxu1 %v582_v1  ;;  %v740_v0 = vunpack.c.l.s8.bf16 %v260_v60  ;;  %v742_v1 = vunpack.c.l.s8.bf16 %v262_v61 }
  0xdf   :  { %1023 = vmatpush1.bf16.msra.mxu0 %v579_v4  ;;  %1105 = vmatpush1.bf16.msra.mxu1 %v581_v5  ;;  %v739_v4 = vunpack.c.l.s8.bf16 %v259_v2  ;;  %v741_v5 = vunpack.c.l.s8.bf16 %v261_v3 }
  0xe0   :  { %1024 = vmatprep.subr.bf16.mxu0 %v596_v6  ;;  %1106 = vmatprep.subr.bf16.mxu1 %v598_v7  ;;  %v756_v6 = vunpack.c.h.s8.bf16 %v260_v60  ;;  %v758_v7 = vunpack.c.h.s8.bf16 %v262_v61  ;;  %v88_v60 = vld [vmem:[#allocation2 + $0x1c8] sm:$0xff]  ;;  %v90_v61 = vld [vmem:[#allocation2 + $0x1d8] sm:$0xff] }
  0xe3   :  { %1025 = vmatpush1.bf16.msra.mxu0 %v595_v10  ;;  %1107 = vmatpush1.bf16.msra.mxu1 %v597_v11  ;;  %v755_v10 = vunpack.c.h.s8.bf16 %v259_v2  ;;  %v757_v11 = vunpack.c.h.s8.bf16 %v261_v3  ;;  %v87_v2 = vld [vmem:[#allocation2 + $0x1c0] sm:$0xff]  ;;  %v89_v3 = vld [vmem:[#allocation2 + $0x1d0] sm:$0xff] }
  0xe4   :  { %1026 = vmatprep.subr.bf16.mxu0 %v612_v12  ;;  %1108 = vmatprep.subr.bf16.mxu1 %v614_v13  ;;  %v772_v12 = vunpack.c.l.s8.bf16 %v276_v8  ;;  %v774_v13 = vunpack.c.l.s8.bf16 %v278_v9 }
  0xe7   :  { %1027 = vmatpush1.bf16.msra.mxu0 %v611_v17  ;;  %1109 = vmatpush1.bf16.msra.mxu1 %v613_v18  ;;  %v771_v17 = vunpack.c.l.s8.bf16 %v275_v14  ;;  %v773_v18 = vunpack.c.l.s8.bf16 %v277_v15 }
  0xe8   :  { %1028 = vmatprep.subr.bf16.mxu0 %v628_v19  ;;  %1110 = vmatprep.subr.bf16.mxu1 %v630_v20  ;;  %v788_v19 = vunpack.c.h.s8.bf16 %v276_v8  ;;  %v790_v20 = vunpack.c.h.s8.bf16 %v278_v9  ;;  %v104_v8 = vld [vmem:[#allocation2 + $0x248] sm:$0xff]  ;;  %v106_v9 = vld [vmem:[#allocation2 + $0x258] sm:$0xff] }
  0xeb   :  { %1029 = vmatpush1.bf16.msra.mxu0 %v627_v23  ;;  %1111 = vmatpush1.bf16.msra.mxu1 %v629_v24  ;;  %v787_v23 = vunpack.c.h.s8.bf16 %v275_v14  ;;  %v789_v24 = vunpack.c.h.s8.bf16 %v277_v15  ;;  %v103_v14 = vld [vmem:[#allocation2 + $0x240] sm:$0xff]  ;;  %v105_v15 = vld [vmem:[#allocation2 + $0x250] sm:$0xff] }
  0xec   :  { %1030 = vmatprep.subr.bf16.mxu0 %v644_v43  ;;  %1112 = vmatprep.subr.bf16.mxu1 %v646_v25  ;;  %v296_v43 = vunpack.c.l.s8.bf16 %v40_v21  ;;  %v298_v25 = vunpack.c.l.s8.bf16 %v42_v22 }
  0xef   :  { %1031 = vmatpush1.bf16.msra.mxu0 %v643_v28  ;;  %1113 = vmatpush1.bf16.msra.mxu1 %v645_v29  ;;  %v295_v28 = vunpack.c.l.s8.bf16 %v39_v26  ;;  %v297_v29 = vunpack.c.l.s8.bf16 %v41_v27 }
  0xf0   :  { %1032 = vmatprep.subr.bf16.mxu0 %v660_v31  ;;  %1114 = vmatprep.subr.bf16.mxu1 %v662_v32  ;;  %v312_v31 = vunpack.c.h.s8.bf16 %v40_v21  ;;  %v314_v32 = vunpack.c.h.s8.bf16 %v42_v22  ;;  %v120_v21 = vld [vmem:[#allocation2 + $0x2c8] sm:$0xff]  ;;  %v122_v22 = vld [vmem:[#allocation2 + $0x2d8] sm:$0xff] }
  0xf3   :  { %1033 = vmatpush1.bf16.msra.mxu0 %v659_v36  ;;  %1115 = vmatpush1.bf16.msra.mxu1 %v661_v37  ;;  %v311_v36 = vunpack.c.h.s8.bf16 %v39_v26  ;;  %v313_v37 = vunpack.c.h.s8.bf16 %v41_v27  ;;  %v119_v26 = vld [vmem:[#allocation2 + $0x2c0] sm:$0xff]  ;;  %v121_v27 = vld [vmem:[#allocation2 + $0x2d0] sm:$0xff] }
  0xf4   :  { %1034 = vmatprep.subr.bf16.mxu0 %v676_v38  ;;  %1116 = vmatprep.subr.bf16.mxu1 %v678_v39  ;;  %v328_v38 = vunpack.c.l.s8.bf16 %v56_v33  ;;  %v330_v39 = vunpack.c.l.s8.bf16 %v58_v34 }
  0xf7   :  { %1035 = vmatpush1.bf16.msra.mxu0 %v675_v44  ;;  %1117 = vmatpush1.bf16.msra.mxu1 %v677_v45  ;;  %v327_v44 = vunpack.c.l.s8.bf16 %v55_v40  ;;  %v329_v45 = vunpack.c.l.s8.bf16 %v57_v41 }
  0xf8   :  { %1036 = vmatprep.subr.bf16.mxu0 %v692_v46  ;;  %1118 = vmatprep.subr.bf16.mxu1 %v694_v47  ;;  %v344_v46 = vunpack.c.h.s8.bf16 %v56_v33  ;;  %v346_v47 = vunpack.c.h.s8.bf16 %v58_v34  ;;  %v136_v33 = vld [vmem:[#allocation2 + $0x348] sm:$0xff]  ;;  %v138_v34 = vld [vmem:[#allocation2 + $0x358] sm:$0xff] }
  0xfb   :  { %1037 = vmatpush1.bf16.msra.mxu0 %v691_v30  ;;  %1119 = vmatpush1.bf16.msra.mxu1 %v693_v51  ;;  %v343_v30 = vunpack.c.h.s8.bf16 %v55_v40  ;;  %v345_v51 = vunpack.c.h.s8.bf16 %v57_v41  ;;  %v135_v40 = vld [vmem:[#allocation2 + $0x340] sm:$0xff]  ;;  %v137_v41 = vld [vmem:[#allocation2 + $0x350] sm:$0xff] }
  0xfc   :  { %1038 = vmatprep.subr.bf16.mxu0 %v708_v52  ;;  %1120 = vmatprep.subr.bf16.mxu1 %v710_v53  ;;  %v360_v52 = vunpack.c.l.s8.bf16 %v72_v48  ;;  %v362_v53 = vunpack.c.l.s8.bf16 %v74_v49 }
  0xff   :  { %1039 = vmatpush1.bf16.msra.mxu0 %v707_v56  ;;  %1121 = vmatpush1.bf16.msra.mxu1 %v709_v57  ;;  %v359_v56 = vunpack.c.l.s8.bf16 %v71_v54  ;;  %v361_v57 = vunpack.c.l.s8.bf16 %v73_v55 }
 0x100   :  { %1040 = vmatprep.subr.bf16.mxu0 %v724_v58  ;;  %1122 = vmatprep.subr.bf16.mxu1 %v726_v59  ;;  %v376_v58 = vunpack.c.h.s8.bf16 %v72_v48  ;;  %v378_v59 = vunpack.c.h.s8.bf16 %v74_v49  ;;  %v152_v48 = vld [vmem:[#allocation2 + $0x3c8] sm:$0xff]  ;;  %v154_v49 = vld [vmem:[#allocation2 + $0x3d8] sm:$0xff] }
 0x103   :  { %1041 = vmatpush1.bf16.msra.mxu0 %v723_v62  ;;  %1123 = vmatpush1.bf16.msra.mxu1 %v725_v63  ;;  %v375_v62 = vunpack.c.h.s8.bf16 %v71_v54  ;;  %v377_v63 = vunpack.c.h.s8.bf16 %v73_v55  ;;  %v151_v54 = vld [vmem:[#allocation2 + $0x3c0] sm:$0xff]  ;;  %v153_v55 = vld [vmem:[#allocation2 + $0x3d0] sm:$0xff] }
 0x104   :  { %1042 = vmatprep.subr.bf16.mxu0 %v740_v0  ;;  %1124 = vmatprep.subr.bf16.mxu1 %v742_v1  ;;  %v392_v0 = vunpack.c.l.s8.bf16 %v88_v60  ;;  %v394_v1 = vunpack.c.l.s8.bf16 %v90_v61 }
 0x107   :  { %1043 = vmatpush1.bf16.msra.mxu0 %v739_v4  ;;  %1125 = vmatpush1.bf16.msra.mxu1 %v741_v5  ;;  %v391_v4 = vunpack.c.l.s8.bf16 %v87_v2  ;;  %v393_v5 = vunpack.c.l.s8.bf16 %v89_v3 }
 0x108   :  { %1044 = vmatprep.subr.bf16.mxu0 %v756_v6  ;;  %1126 = vmatprep.subr.bf16.mxu1 %v758_v7  ;;  %v408_v6 = vunpack.c.h.s8.bf16 %v88_v60  ;;  %v410_v7 = vunpack.c.h.s8.bf16 %v90_v61  ;;  %v168_v60 = vld [vmem:[#allocation2 + $0x448] sm:$0xff]  ;;  %v170_v61 = vld [vmem:[#allocation2 + $0x458] sm:$0xff] }
 0x10b   :  { %1045 = vmatpush1.bf16.msra.mxu0 %v755_v10  ;;  %1127 = vmatpush1.bf16.msra.mxu1 %v757_v11  ;;  %v407_v10 = vunpack.c.h.s8.bf16 %v87_v2  ;;  %v409_v11 = vunpack.c.h.s8.bf16 %v89_v3  ;;  %v167_v2 = vld [vmem:[#allocation2 + $0x440] sm:$0xff]  ;;  %v169_v3 = vld [vmem:[#allocation2 + $0x450] sm:$0xff] }
 0x10c   :  { %1046 = vmatprep.subr.bf16.mxu0 %v772_v12  ;;  %1128 = vmatprep.subr.bf16.mxu1 %v774_v13  ;;  %v424_v12 = vunpack.c.l.s8.bf16 %v104_v8  ;;  %v426_v13 = vunpack.c.l.s8.bf16 %v106_v9 }
 0x10f   :  { %1047 = vmatpush1.bf16.msra.mxu0 %v771_v17  ;;  %1129 = vmatpush1.bf16.msra.mxu1 %v773_v18  ;;  %v423_v17 = vunpack.c.l.s8.bf16 %v103_v14  ;;  %v425_v18 = vunpack.c.l.s8.bf16 %v105_v15 }
 0x110   :  { %1048 = vmatprep.subr.bf16.mxu0 %v788_v19  ;;  %1130 = vmatprep.subr.bf16.mxu1 %v790_v20  ;;  %v440_v19 = vunpack.c.h.s8.bf16 %v104_v8  ;;  %v442_v20 = vunpack.c.h.s8.bf16 %v106_v9  ;;  %v184_v8 = vld [vmem:[#allocation2 + $0x4c8] sm:$0xff]  ;;  %v186_v9 = vld [vmem:[#allocation2 + $0x4d8] sm:$0xff] }
 0x113   :  { %1049 = vmatpush1.bf16.msra.mxu0 %v787_v23  ;;  %1131 = vmatpush1.bf16.msra.mxu1 %v789_v24  ;;  %v439_v23 = vunpack.c.h.s8.bf16 %v103_v14  ;;  %v441_v24 = vunpack.c.h.s8.bf16 %v105_v15  ;;  %v183_v14 = vld [vmem:[#allocation2 + $0x4c0] sm:$0xff]  ;;  %v185_v15 = vld [vmem:[#allocation2 + $0x4d0] sm:$0xff] }
 0x114   :  { %1141 = vmatprep.subr.bf16.mxu0 %v296_v43  ;;  %1223 = vmatprep.subr.bf16.mxu1 %v298_v25  ;;  %v456_v43 = vunpack.c.l.s8.bf16 %v120_v21  ;;  %v458_v25 = vunpack.c.l.s8.bf16 %v122_v22 }
 0x116   :  { %1051 = vmatmul.mubr.bf16.vlgmr.msra.gmra.mrb[4].mxu0 %v1854_v16  ;;  %1133 = vmatmul.mubr.bf16.vlgmr.msra.gmra.mrb[4].mxu1 %v1854_v16 }
 0x117   :  { %1142 = vmatpush1.bf16.msra.mxu0 %v295_v28  ;;  %1224 = vmatpush1.bf16.msra.mxu1 %v297_v29  ;;  %v455_v28 = vunpack.c.l.s8.bf16 %v119_v26  ;;  %v457_v29 = vunpack.c.l.s8.bf16 %v121_v27 }
 0x118   :  { %1143 = vmatprep.subr.bf16.mxu0 %v312_v31  ;;  %1225 = vmatprep.subr.bf16.mxu1 %v314_v32  ;;  %v472_v31 = vunpack.c.h.s8.bf16 %v120_v21  ;;  %v474_v32 = vunpack.c.h.s8.bf16 %v122_v22  ;;  %v200_v21 = vld [vmem:[#allocation2 + $0x548] sm:$0xff]  ;;  %v202_v22 = vld [vmem:[#allocation2 + $0x558] sm:$0xff] }
 0x119   :  { %1173 = vmatprep.mubr.bf16.mxu0 %v1831_v35  ;;  %1255 = vmatprep.mubr.bf16.mxu1 %v1831_v35 }
 0x11b   :  { %1144 = vmatpush1.bf16.msra.mxu0 %v311_v36  ;;  %1226 = vmatpush1.bf16.msra.mxu1 %v313_v37  ;;  %v471_v36 = vunpack.c.h.s8.bf16 %v119_v26  ;;  %v473_v37 = vunpack.c.h.s8.bf16 %v121_v27  ;;  %v199_v26 = vld [vmem:[#allocation2 + $0x540] sm:$0xff]  ;;  %v201_v27 = vld [vmem:[#allocation2 + $0x550] sm:$0xff] }
 0x11c   :  { %1145 = vmatprep.subr.bf16.mxu0 %v328_v38  ;;  %1227 = vmatprep.subr.bf16.mxu1 %v330_v39  ;;  %v488_v38 = vunpack.c.l.s8.bf16 %v136_v33  ;;  %v490_v39 = vunpack.c.l.s8.bf16 %v138_v34 }
 0x11f   :  { %1146 = vmatpush1.bf16.msra.mxu0 %v327_v44  ;;  %1228 = vmatpush1.bf16.msra.mxu1 %v329_v45  ;;  %v487_v44 = vunpack.c.l.s8.bf16 %v135_v40  ;;  %v489_v45 = vunpack.c.l.s8.bf16 %v137_v41 }
 0x120   :  { %1147 = vmatprep.subr.bf16.mxu0 %v344_v46  ;;  %1229 = vmatprep.subr.bf16.mxu1 %v346_v47  ;;  %v504_v46 = vunpack.c.h.s8.bf16 %v136_v33  ;;  %v506_v47 = vunpack.c.h.s8.bf16 %v138_v34  ;;  %v216_v33 = vld [vmem:[#allocation2 + $0x5c8] sm:$0xff]  ;;  %v218_v34 = vld [vmem:[#allocation2 + $0x5d8] sm:$0xff] }
 0x123   :  { %1148 = vmatpush1.bf16.msra.mxu0 %v343_v30  ;;  %1230 = vmatpush1.bf16.msra.mxu1 %v345_v51  ;;  %v503_v30 = vunpack.c.h.s8.bf16 %v135_v40  ;;  %v505_v51 = vunpack.c.h.s8.bf16 %v137_v41  ;;  %v215_v40 = vld [vmem:[#allocation2 + $0x5c0] sm:$0xff]  ;;  %v217_v41 = vld [vmem:[#allocation2 + $0x5d0] sm:$0xff] }
 0x124   :  { %1149 = vmatprep.subr.bf16.mxu0 %v360_v52  ;;  %1231 = vmatprep.subr.bf16.mxu1 %v362_v53  ;;  %v520_v52 = vunpack.c.l.s8.bf16 %v152_v48  ;;  %v522_v53 = vunpack.c.l.s8.bf16 %v154_v49 }
 0x127   :  { %1150 = vmatpush1.bf16.msra.mxu0 %v359_v56  ;;  %1232 = vmatpush1.bf16.msra.mxu1 %v361_v57  ;;  %v519_v56 = vunpack.c.l.s8.bf16 %v151_v54  ;;  %v521_v57 = vunpack.c.l.s8.bf16 %v153_v55 }
 0x128   :  { %1151 = vmatprep.subr.bf16.mxu0 %v376_v58  ;;  %1233 = vmatprep.subr.bf16.mxu1 %v378_v59  ;;  %v536_v58 = vunpack.c.h.s8.bf16 %v152_v48  ;;  %v538_v59 = vunpack.c.h.s8.bf16 %v154_v49 }
 0x12b   :  { %1152 = vmatpush1.bf16.msra.mxu0 %v375_v62  ;;  %1234 = vmatpush1.bf16.msra.mxu1 %v377_v63  ;;  %v535_v62 = vunpack.c.h.s8.bf16 %v151_v54  ;;  %v537_v63 = vunpack.c.h.s8.bf16 %v153_v55  ;;  %v664_v54 = vunpack.c.h.s8.bf16 %v216_v33  ;;  %v666_v55 = vunpack.c.h.s8.bf16 %v218_v34 }
 0x12c   :  { %1153 = vmatprep.subr.bf16.mxu0 %v392_v0  ;;  %1235 = vmatprep.subr.bf16.mxu1 %v394_v1  ;;  %v552_v0 = vunpack.c.l.s8.bf16 %v168_v60  ;;  %v554_v1 = vunpack.c.l.s8.bf16 %v170_v61 }
 0x12f   :  { %1154 = vmatpush1.bf16.msra.mxu0 %v391_v4  ;;  %1236 = vmatpush1.bf16.msra.mxu1 %v393_v5  ;;  %v551_v4 = vunpack.c.l.s8.bf16 %v167_v2  ;;  %v553_v5 = vunpack.c.l.s8.bf16 %v169_v3 }
 0x130   :  { %1155 = vmatprep.subr.bf16.mxu0 %v408_v6  ;;  %1237 = vmatprep.subr.bf16.mxu1 %v410_v7  ;;  %v568_v6 = vunpack.c.h.s8.bf16 %v168_v60  ;;  %v570_v7 = vunpack.c.h.s8.bf16 %v170_v61 }
 0x133   :  { %1156 = vmatpush1.bf16.msra.mxu0 %v407_v10  ;;  %1238 = vmatpush1.bf16.msra.mxu1 %v409_v11  ;;  %v567_v10 = vunpack.c.h.s8.bf16 %v167_v2  ;;  %v569_v11 = vunpack.c.h.s8.bf16 %v169_v3 }
 0x134   :  { %1157 = vmatprep.subr.bf16.mxu0 %v424_v12  ;;  %1239 = vmatprep.subr.bf16.mxu1 %v426_v13  ;;  %v584_v12 = vunpack.c.l.s8.bf16 %v184_v8  ;;  %v586_v13 = vunpack.c.l.s8.bf16 %v186_v9 }
 0x137   :  { %1158 = vmatpush1.bf16.msra.mxu0 %v423_v17  ;;  %1240 = vmatpush1.bf16.msra.mxu1 %v425_v18  ;;  %v583_v17 = vunpack.c.l.s8.bf16 %v183_v14  ;;  %v585_v18 = vunpack.c.l.s8.bf16 %v185_v15 }
 0x138   :  { %1159 = vmatprep.subr.bf16.mxu0 %v440_v19  ;;  %1241 = vmatprep.subr.bf16.mxu1 %v442_v20  ;;  %v600_v19 = vunpack.c.h.s8.bf16 %v184_v8  ;;  %v602_v20 = vunpack.c.h.s8.bf16 %v186_v9 }
 0x13b   :  { %1160 = vmatpush1.bf16.msra.mxu0 %v439_v23  ;;  %1242 = vmatpush1.bf16.msra.mxu1 %v441_v24  ;;  %v599_v23 = vunpack.c.h.s8.bf16 %v183_v14  ;;  %v601_v24 = vunpack.c.h.s8.bf16 %v185_v15 }
 0x13c   :  { %1161 = vmatprep.subr.bf16.mxu0 %v456_v43  ;;  %1243 = vmatprep.subr.bf16.mxu1 %v458_v25  ;;  %v616_v43 = vunpack.c.l.s8.bf16 %v200_v21  ;;  %v618_v25 = vunpack.c.l.s8.bf16 %v202_v22 }
 0x13f   :  { %1162 = vmatpush1.bf16.msra.mxu0 %v455_v28  ;;  %1244 = vmatpush1.bf16.msra.mxu1 %v457_v29  ;;  %v615_v28 = vunpack.c.l.s8.bf16 %v199_v26  ;;  %v617_v29 = vunpack.c.l.s8.bf16 %v201_v27 }
 0x140   :  { %1163 = vmatprep.subr.bf16.mxu0 %v472_v31  ;;  %1245 = vmatprep.subr.bf16.mxu1 %v474_v32  ;;  %v632_v31 = vunpack.c.h.s8.bf16 %v200_v21  ;;  %v634_v32 = vunpack.c.h.s8.bf16 %v202_v22 }
 0x143   :  { %1164 = vmatpush1.bf16.msra.mxu0 %v471_v36  ;;  %1246 = vmatpush1.bf16.msra.mxu1 %v473_v37  ;;  %v631_v36 = vunpack.c.h.s8.bf16 %v199_v26  ;;  %v633_v37 = vunpack.c.h.s8.bf16 %v201_v27 }
 0x144   :  { %1165 = vmatprep.subr.bf16.mxu0 %v488_v38  ;;  %1247 = vmatprep.subr.bf16.mxu1 %v490_v39  ;;  %v648_v38 = vunpack.c.l.s8.bf16 %v216_v33  ;;  %v650_v39 = vunpack.c.l.s8.bf16 %v218_v34 }
 0x147   :  { %1166 = vmatpush1.bf16.msra.mxu0 %v487_v44  ;;  %1248 = vmatpush1.bf16.msra.mxu1 %v489_v45 }
 0x148   :  { %1167 = vmatprep.subr.bf16.mxu0 %v504_v46  ;;  %1249 = vmatprep.subr.bf16.mxu1 %v506_v47 }
 0x14b   :  { %1168 = vmatpush1.bf16.msra.mxu0 %v503_v30  ;;  %1250 = vmatpush1.bf16.msra.mxu1 %v505_v51  ;;  %v647_v30 = vunpack.c.l.s8.bf16 %v215_v40  ;;  %v649_v51 = vunpack.c.l.s8.bf16 %v217_v41 }
 0x14c   :  { %1169 = vmatprep.subr.bf16.mxu0 %v520_v52  ;;  %1251 = vmatprep.subr.bf16.mxu1 %v522_v53 }
 0x14f   :  { %1170 = vmatpush1.bf16.msra.mxu0 %v519_v56  ;;  %1252 = vmatpush1.bf16.msra.mxu1 %v521_v57  ;;  %v232_v56 = vld [vmem:[#allocation2 + $0x648] sm:$0xff]  ;;  %v234_v57 = vld [vmem:[#allocation2 + $0x658] sm:$0xff] }
 0x150   :  { %1171 = vmatprep.subr.bf16.mxu0 %v536_v58  ;;  %1253 = vmatprep.subr.bf16.mxu1 %v538_v59  ;;  %v663_v58 = vunpack.c.h.s8.bf16 %v215_v40  ;;  %v665_v59 = vunpack.c.h.s8.bf16 %v217_v41  ;;  %v680_v60 = vunpack.c.l.s8.bf16 %v232_v56  ;;  %v682_v61 = vunpack.c.l.s8.bf16 %v234_v57 }
 0x151   :  { %v696_v2 = vunpack.c.h.s8.bf16 %v232_v56  ;;  %v698_v3 = vunpack.c.h.s8.bf16 %v234_v57 }
 0x153   :  { %1172 = vmatpush1.bf16.msra.mxu0 %v535_v62  ;;  %1254 = vmatpush1.bf16.msra.mxu1 %v537_v63  ;;  %v231_v62 = vld [vmem:[#allocation2 + $0x640] sm:$0xff]  ;;  %v233_v63 = vld [vmem:[#allocation2 + $0x650] sm:$0xff] }
 0x154   :  { %1182 = vmatprep.subr.bf16.mxu0 %v552_v0  ;;  %1264 = vmatprep.subr.bf16.mxu1 %v554_v1  ;;  %v679_v0 = vunpack.c.l.s8.bf16 %v231_v62  ;;  %v681_v1 = vunpack.c.l.s8.bf16 %v233_v63 }
 0x156   :  { %1174 = vmatmul.mubr.bf16.vlgmr.msra.gmra.mrb[8].mxu0 %v1837_v42  ;;  %1256 = vmatmul.mubr.bf16.vlgmr.msra.gmra.mrb[8].mxu1 %v1837_v42 }
 0x157   :  { %1183 = vmatpush1.bf16.msra.mxu0 %v551_v4  ;;  %1265 = vmatpush1.bf16.msra.mxu1 %v553_v5  ;;  %v248_v4 = vld [vmem:[#allocation2 + $0x6c8] sm:$0xff]  ;;  %v250_v5 = vld [vmem:[#allocation2 + $0x6d8] sm:$0xff] }
 0x158   :  { %1184 = vmatprep.subr.bf16.mxu0 %v568_v6  ;;  %1266 = vmatprep.subr.bf16.mxu1 %v570_v7  ;;  %v695_v6 = vunpack.c.h.s8.bf16 %v231_v62  ;;  %v697_v7 = vunpack.c.h.s8.bf16 %v233_v63  ;;  %v712_v8 = vunpack.c.l.s8.bf16 %v248_v4  ;;  %v714_v9 = vunpack.c.l.s8.bf16 %v250_v5 }
 0x159   :  { %1214 = vmatprep.mubr.bf16.mxu0 %v1846_v50  ;;  %1296 = vmatprep.mubr.bf16.mxu1 %v1846_v50  ;;  %v728_v14 = vunpack.c.h.s8.bf16 %v248_v4  ;;  %v730_v15 = vunpack.c.h.s8.bf16 %v250_v5 }
 0x15b   :  { %1185 = vmatpush1.bf16.msra.mxu0 %v567_v10  ;;  %1267 = vmatpush1.bf16.msra.mxu1 %v569_v11  ;;  %v247_v10 = vld [vmem:[#allocation2 + $0x6c0] sm:$0xff]  ;;  %v249_v11 = vld [vmem:[#allocation2 + $0x6d0] sm:$0xff] }
 0x15c   :  { %1186 = vmatprep.subr.bf16.mxu0 %v584_v12  ;;  %1268 = vmatprep.subr.bf16.mxu1 %v586_v13  ;;  %v711_v12 = vunpack.c.l.s8.bf16 %v247_v10  ;;  %v713_v13 = vunpack.c.l.s8.bf16 %v249_v11 }
 0x15f   :  { %1187 = vmatpush1.bf16.msra.mxu0 %v583_v17  ;;  %1269 = vmatpush1.bf16.msra.mxu1 %v585_v18  ;;  %v264_v17 = vld [vmem:[#allocation2 + $0x748] sm:$0xff]  ;;  %v266_v18 = vld [vmem:[#allocation2 + $0x758] sm:$0xff] }
 0x160   :  { %1188 = vmatprep.subr.bf16.mxu0 %v600_v19  ;;  %1270 = vmatprep.subr.bf16.mxu1 %v602_v20  ;;  %v727_v19 = vunpack.c.h.s8.bf16 %v247_v10  ;;  %v729_v20 = vunpack.c.h.s8.bf16 %v249_v11  ;;  %v744_v21 = vunpack.c.l.s8.bf16 %v264_v17  ;;  %v746_v22 = vunpack.c.l.s8.bf16 %v266_v18 }
 0x161   :  { %v760_v26 = vunpack.c.h.s8.bf16 %v264_v17  ;;  %v762_v27 = vunpack.c.h.s8.bf16 %v266_v18 }
 0x163   :  { %1189 = vmatpush1.bf16.msra.mxu0 %v599_v23  ;;  %1271 = vmatpush1.bf16.msra.mxu1 %v601_v24  ;;  %v263_v23 = vld [vmem:[#allocation2 + $0x740] sm:$0xff]  ;;  %v265_v24 = vld [vmem:[#allocation2 + $0x750] sm:$0xff] }
 0x164   :  { %1190 = vmatprep.subr.bf16.mxu0 %v616_v43  ;;  %1272 = vmatprep.subr.bf16.mxu1 %v618_v25  ;;  %v743_v43 = vunpack.c.l.s8.bf16 %v263_v23  ;;  %v745_v25 = vunpack.c.l.s8.bf16 %v265_v24 }
 0x167   :  { %1191 = vmatpush1.bf16.msra.mxu0 %v615_v28  ;;  %1273 = vmatpush1.bf16.msra.mxu1 %v617_v29  ;;  %v280_v28 = vld [vmem:[#allocation2 + $0x7c8] sm:$0xff]  ;;  %v282_v29 = vld [vmem:[#allocation2 + $0x7d8] sm:$0xff] }
 0x168   :  { %1192 = vmatprep.subr.bf16.mxu0 %v632_v31  ;;  %1274 = vmatprep.subr.bf16.mxu1 %v634_v32  ;;  %v759_v31 = vunpack.c.h.s8.bf16 %v263_v23  ;;  %v761_v32 = vunpack.c.h.s8.bf16 %v265_v24  ;;  %v776_v33 = vunpack.c.l.s8.bf16 %v280_v28  ;;  %v778_v34 = vunpack.c.l.s8.bf16 %v282_v29 }
 0x169   :  { %v1872_v44 = vpop.f32.mrb[0].mxu0  ;;  %v1874_v45 = vpop.f32.mrb[0].mxu1  ;;  %v792_v40 = vunpack.c.h.s8.bf16 %v280_v28  ;;  %v794_v41 = vunpack.c.h.s8.bf16 %v282_v29 }
 0x16a   :  { %v1876_v46 = vpop.f32.mrb[1].mxu0  ;;  %v1878_v47 = vpop.f32.mrb[1].mxu1 }
 0x16b   :  { %v892_v48 = vpop.f32.mrb[2].mxu0  ;;  %v974_v49 = vpop.f32.mrb[2].mxu1  ;;  %1193 = vmatpush1.bf16.msra.mxu0 %v631_v36  ;;  %1275 = vmatpush1.bf16.msra.mxu1 %v633_v37  ;;  %v279_v36 = vld [vmem:[#allocation2 + $0x7c0] sm:$0xff]  ;;  %v281_v37 = vld [vmem:[#allocation2 + $0x7d0] sm:$0xff] }
 0x16c   :  { %v893_v52 = vpop.f32.mrb[3].mxu0  ;;  %v975_v53 = vpop.f32.mrb[3].mxu1  ;;  %1194 = vmatprep.subr.bf16.mxu0 %v648_v38  ;;  %1276 = vmatprep.subr.bf16.mxu1 %v650_v39  ;;  %v775_v38 = vunpack.c.l.s8.bf16 %v279_v36  ;;  %v777_v39 = vunpack.c.l.s8.bf16 %v281_v37  ;;  %v44_v48 = vld [vmem:[#allocation2 + $0x68] sm:$0xff]  ;;  %v46_v49 = vld [vmem:[#allocation2 + $0x78] sm:$0xff] }
 0x16d   :  { %v300_v52 = vunpack.c.l.s8.bf16 %v44_v48  ;;  %v302_v53 = vunpack.c.l.s8.bf16 %v46_v49 }
 0x16f   :  { %1195 = vmatpush1.bf16.msra.mxu0 %v647_v30  ;;  %1277 = vmatpush1.bf16.msra.mxu1 %v649_v51  ;;  %v791_v30 = vunpack.c.h.s8.bf16 %v279_v36  ;;  %v793_v51 = vunpack.c.h.s8.bf16 %v281_v37 }
 0x170   :  { %1196 = vmatprep.subr.bf16.mxu0 %v664_v54  ;;  %1278 = vmatprep.subr.bf16.mxu1 %v666_v55  ;;  %v43_v54 = vld [vmem:[#allocation2 + $0x60] sm:$0xff]  ;;  %v45_v55 = vld [vmem:[#allocation2 + $0x70] sm:$0xff] }
 0x171   :  { %v299_v56 = vunpack.c.l.s8.bf16 %v43_v54  ;;  %v301_v57 = vunpack.c.l.s8.bf16 %v45_v55  ;;  %v315_v62 = vunpack.c.h.s8.bf16 %v43_v54  ;;  %v317_v63 = vunpack.c.h.s8.bf16 %v45_v55 }
 0x173   :  { %1197 = vmatpush1.bf16.msra.mxu0 %v663_v58  ;;  %1279 = vmatpush1.bf16.msra.mxu1 %v665_v59  ;;  %v316_v58 = vunpack.c.h.s8.bf16 %v44_v48  ;;  %v318_v59 = vunpack.c.h.s8.bf16 %v46_v49 }
 0x174   :  { %1198 = vmatprep.subr.bf16.mxu0 %v680_v60  ;;  %1280 = vmatprep.subr.bf16.mxu1 %v682_v61  ;;  %v60_v60 = vld [vmem:[#allocation2 + $0xe8] sm:$0xff]  ;;  %v62_v61 = vld [vmem:[#allocation2 + $0xf8] sm:$0xff] }
 0x177   :  { %1199 = vmatpush1.bf16.msra.mxu0 %v679_v0  ;;  %1281 = vmatpush1.bf16.msra.mxu1 %v681_v1  ;;  %v332_v0 = vunpack.c.l.s8.bf16 %v60_v60  ;;  %v334_v1 = vunpack.c.l.s8.bf16 %v62_v61 }
 0x178   :  { %1200 = vmatprep.subr.bf16.mxu0 %v696_v2  ;;  %1282 = vmatprep.subr.bf16.mxu1 %v698_v3  ;;  %v59_v2 = vld [vmem:[#allocation2 + $0xe0] sm:$0xff]  ;;  %v61_v3 = vld [vmem:[#allocation2 + $0xf0] sm:$0xff] }
 0x179   :  { %v331_v4 = vunpack.c.l.s8.bf16 %v59_v2  ;;  %v333_v5 = vunpack.c.l.s8.bf16 %v61_v3  ;;  %v347_v10 = vunpack.c.h.s8.bf16 %v59_v2  ;;  %v349_v11 = vunpack.c.h.s8.bf16 %v61_v3 }
 0x17b   :  { %1201 = vmatpush1.bf16.msra.mxu0 %v695_v6  ;;  %1283 = vmatpush1.bf16.msra.mxu1 %v697_v7  ;;  %v348_v6 = vunpack.c.h.s8.bf16 %v60_v60  ;;  %v350_v7 = vunpack.c.h.s8.bf16 %v62_v61 }
 0x17c   :  { %1202 = vmatprep.subr.bf16.mxu0 %v712_v8  ;;  %1284 = vmatprep.subr.bf16.mxu1 %v714_v9  ;;  %v76_v8 = vld [vmem:[#allocation2 + $0x168] sm:$0xff]  ;;  %v78_v9 = vld [vmem:[#allocation2 + $0x178] sm:$0xff] }
 0x17d   :  { %v380_v18 = vunpack.c.h.s8.bf16 %v76_v8 }
 0x17f   :  { %1203 = vmatpush1.bf16.msra.mxu0 %v711_v12  ;;  %1285 = vmatpush1.bf16.msra.mxu1 %v713_v13  ;;  %v364_v12 = vunpack.c.l.s8.bf16 %v76_v8  ;;  %v366_v13 = vunpack.c.l.s8.bf16 %v78_v9 }
 0x180   :  { %1204 = vmatprep.subr.bf16.mxu0 %v728_v14  ;;  %1286 = vmatprep.subr.bf16.mxu1 %v730_v15  ;;  %v75_v14 = vld [vmem:[#allocation2 + $0x160] sm:$0xff] }
 0x181   :  { %v363_v15 = vunpack.c.l.s8.bf16 %v75_v14 }
 0x183   :  { %1205 = vmatpush1.bf16.msra.mxu0 %v727_v19  ;;  %1287 = vmatpush1.bf16.msra.mxu1 %v729_v20  ;;  %v382_v19 = vunpack.c.h.s8.bf16 %v78_v9  ;;  %v92_v20 = vld [vmem:[#allocation2 + $0x1e8] sm:$0xff] }
 0x184   :  { %1206 = vmatprep.subr.bf16.mxu0 %v744_v21  ;;  %1288 = vmatprep.subr.bf16.mxu1 %v746_v22  ;;  %v94_v21 = vld [vmem:[#allocation2 + $0x1f8] sm:$0xff]  ;;  %v379_v22 = vunpack.c.h.s8.bf16 %v75_v14  ;;  %v396_v24 = vunpack.c.l.s8.bf16 %v92_v20  ;;  %v412_v29 = vunpack.c.h.s8.bf16 %v92_v20 }
 0x187   :  { %1207 = vmatpush1.bf16.msra.mxu0 %v743_v43  ;;  %1289 = vmatpush1.bf16.msra.mxu1 %v745_v25  ;;  %v398_v43 = vunpack.c.l.s8.bf16 %v94_v21  ;;  %v91_v25 = vld [vmem:[#allocation2 + $0x1e0] sm:$0xff] }
 0x188   :  { %1208 = vmatprep.subr.bf16.mxu0 %v760_v26  ;;  %1290 = vmatprep.subr.bf16.mxu1 %v762_v27  ;;  %v93_v26 = vld [vmem:[#allocation2 + $0x1f0] sm:$0xff]  ;;  %v395_v27 = vunpack.c.l.s8.bf16 %v91_v25 }
 0x189   :  { %v397_v28 = vunpack.c.l.s8.bf16 %v93_v26  ;;  %v413_v36 = vunpack.c.h.s8.bf16 %v93_v26 }
 0x18b   :  { %1209 = vmatpush1.bf16.msra.mxu0 %v759_v31  ;;  %1291 = vmatpush1.bf16.msra.mxu1 %v761_v32  ;;  %v414_v31 = vunpack.c.h.s8.bf16 %v94_v21  ;;  %v108_v32 = vld [vmem:[#allocation2 + $0x268] sm:$0xff] }
 0x18c   :  { %1210 = vmatprep.subr.bf16.mxu0 %v776_v33  ;;  %1292 = vmatprep.subr.bf16.mxu1 %v778_v34  ;;  %v110_v33 = vld [vmem:[#allocation2 + $0x278] sm:$0xff]  ;;  %v411_v34 = vunpack.c.h.s8.bf16 %v91_v25  ;;  %v428_v37 = vunpack.c.l.s8.bf16 %v108_v32  ;;  %v444_v49 = vunpack.c.h.s8.bf16 %v108_v32 }
 0x18f   :  { %1211 = vmatpush1.bf16.msra.mxu0 %v775_v38  ;;  %1293 = vmatpush1.bf16.msra.mxu1 %v777_v39  ;;  %v430_v38 = vunpack.c.l.s8.bf16 %v110_v33  ;;  %v107_v39 = vld [vmem:[#allocation2 + $0x260] sm:$0xff] }
 0x190   :  { %1212 = vmatprep.subr.bf16.mxu0 %v792_v40  ;;  %1294 = vmatprep.subr.bf16.mxu1 %v794_v41  ;;  %v109_v40 = vld [vmem:[#allocation2 + $0x270] sm:$0xff]  ;;  %v427_v41 = vunpack.c.l.s8.bf16 %v107_v39 }
 0x191   :  { %v429_v48 = vunpack.c.l.s8.bf16 %v109_v40  ;;  %v445_v54 = vunpack.c.h.s8.bf16 %v109_v40 }
 0x193   :  { %1213 = vmatpush1.bf16.msra.mxu0 %v791_v30  ;;  %1295 = vmatpush1.bf16.msra.mxu1 %v793_v51  ;;  %v446_v30 = vunpack.c.h.s8.bf16 %v110_v33  ;;  %v124_v51 = vld [vmem:[#allocation2 + $0x2e8] sm:$0xff] }
 0x194   :  { %1305 = vmatprep.subr.bf16.mxu0 %v300_v52  ;;  %1387 = vmatprep.subr.bf16.mxu1 %v302_v53  ;;  %v126_v52 = vld [vmem:[#allocation2 + $0x2f8] sm:$0xff]  ;;  %v443_v53 = vunpack.c.h.s8.bf16 %v107_v39  ;;  %v460_v55 = vunpack.c.l.s8.bf16 %v124_v51  ;;  %v476_v61 = vunpack.c.h.s8.bf16 %v124_v51 }
 0x196   :  { %1215 = vmatmul.mubr.bf16.vlgmr.msra.gmra.mrb[8].mxu0 %v1854_v16  ;;  %1297 = vmatmul.mubr.bf16.vlgmr.msra.gmra.mrb[8].mxu1 %v1854_v16 }
 0x197   :  { %1306 = vmatpush1.bf16.msra.mxu0 %v299_v56  ;;  %1388 = vmatpush1.bf16.msra.mxu1 %v301_v57  ;;  %v462_v56 = vunpack.c.l.s8.bf16 %v126_v52  ;;  %v123_v57 = vld [vmem:[#allocation2 + $0x2e0] sm:$0xff] }
 0x198   :  { %1307 = vmatprep.subr.bf16.mxu0 %v316_v58  ;;  %1389 = vmatprep.subr.bf16.mxu1 %v318_v59  ;;  %v125_v58 = vld [vmem:[#allocation2 + $0x2f0] sm:$0xff]  ;;  %v459_v59 = vunpack.c.l.s8.bf16 %v123_v57 }
 0x199   :  { %1337 = vmatprep.mubr.bf16.mxu0 %v1831_v35  ;;  %1419 = vmatprep.mubr.bf16.mxu1 %v1831_v35  ;;  %v77_v35 = vld [vmem:[#allocation2 + $0x170] sm:$0xff]  ;;  %v461_v60 = vunpack.c.l.s8.bf16 %v125_v58  ;;  %v477_v2 = vunpack.c.h.s8.bf16 %v125_v58 }
 0x19a   :  { %v365_v17 = vunpack.c.l.s8.bf16 %v77_v35  ;;  %v381_v23 = vunpack.c.h.s8.bf16 %v77_v35 }
 0x19b   :  { %1308 = vmatpush1.bf16.msra.mxu0 %v315_v62  ;;  %1390 = vmatpush1.bf16.msra.mxu1 %v317_v63  ;;  %v478_v62 = vunpack.c.h.s8.bf16 %v126_v52  ;;  %v140_v63 = vld [vmem:[#allocation2 + $0x368] sm:$0xff] }
 0x19c   :  { %1309 = vmatprep.subr.bf16.mxu0 %v332_v0  ;;  %1391 = vmatprep.subr.bf16.mxu1 %v334_v1  ;;  %v142_v0 = vld [vmem:[#allocation2 + $0x378] sm:$0xff]  ;;  %v475_v1 = vunpack.c.h.s8.bf16 %v123_v57  ;;  %v492_v3 = vunpack.c.l.s8.bf16 %v140_v63  ;;  %v508_v9 = vunpack.c.h.s8.bf16 %v140_v63 }
 0x19f   :  { %1310 = vmatpush1.bf16.msra.mxu0 %v331_v4  ;;  %1392 = vmatpush1.bf16.msra.mxu1 %v333_v5  ;;  %v494_v4 = vunpack.c.l.s8.bf16 %v142_v0  ;;  %v139_v5 = vld [vmem:[#allocation2 + $0x360] sm:$0xff] }
 0x1a0   :  { %1311 = vmatprep.subr.bf16.mxu0 %v348_v6  ;;  %1393 = vmatprep.subr.bf16.mxu1 %v350_v7  ;;  %v141_v6 = vld [vmem:[#allocation2 + $0x370] sm:$0xff]  ;;  %v491_v7 = vunpack.c.l.s8.bf16 %v139_v5 }
 0x1a1   :  { %v493_v8 = vunpack.c.l.s8.bf16 %v141_v6  ;;  %v509_v14 = vunpack.c.h.s8.bf16 %v141_v6  ;;  %v219_v6 = vld [vmem:[#allocation2 + $0x5e0] sm:$0xff] }
 0x1a3   :  { %1312 = vmatpush1.bf16.msra.mxu0 %v347_v10  ;;  %1394 = vmatpush1.bf16.msra.mxu1 %v349_v11  ;;  %v510_v10 = vunpack.c.h.s8.bf16 %v142_v0  ;;  %v156_v11 = vld [vmem:[#allocation2 + $0x3e8] sm:$0xff] }
 0x1a4   :  { %1313 = vmatprep.subr.bf16.mxu0 %v364_v12  ;;  %1395 = vmatprep.subr.bf16.mxu1 %v366_v13  ;;  %v158_v12 = vld [vmem:[#allocation2 + $0x3f8] sm:$0xff]  ;;  %v507_v13 = vunpack.c.h.s8.bf16 %v139_v5  ;;  %v524_v35 = vunpack.c.l.s8.bf16 %v156_v11  ;;  %v540_v21 = vunpack.c.h.s8.bf16 %v156_v11  ;;  %v220_v0 = vld [vmem:[#allocation2 + $0x5e8] sm:$0xff] }
 0x1a7   :  { %1314 = vmatpush1.bf16.msra.mxu0 %v363_v15  ;;  %1396 = vmatpush1.bf16.msra.mxu1 %v365_v17  ;;  %v526_v15 = vunpack.c.l.s8.bf16 %v158_v12  ;;  %v155_v17 = vld [vmem:[#allocation2 + $0x3e0] sm:$0xff] }
 0x1a8   :  { %1315 = vmatprep.subr.bf16.mxu0 %v380_v18  ;;  %1397 = vmatprep.subr.bf16.mxu1 %v382_v19  ;;  %v157_v18 = vld [vmem:[#allocation2 + $0x3f0] sm:$0xff]  ;;  %v523_v19 = vunpack.c.l.s8.bf16 %v155_v17 }
 0x1a9   :  { %v525_v20 = vunpack.c.l.s8.bf16 %v157_v18  ;;  %v541_v25 = vunpack.c.h.s8.bf16 %v157_v18  ;;  %v668_v18 = vunpack.c.h.s8.bf16 %v220_v0 }
 0x1ab   :  { %1316 = vmatpush1.bf16.msra.mxu0 %v379_v22  ;;  %1398 = vmatpush1.bf16.msra.mxu1 %v381_v23  ;;  %v542_v22 = vunpack.c.h.s8.bf16 %v158_v12  ;;  %v172_v23 = vld [vmem:[#allocation2 + $0x468] sm:$0xff] }
 0x1ac   :  { %1317 = vmatprep.subr.bf16.mxu0 %v396_v24  ;;  %1399 = vmatprep.subr.bf16.mxu1 %v398_v43  ;;  %v174_v24 = vld [vmem:[#allocation2 + $0x478] sm:$0xff]  ;;  %v539_v43 = vunpack.c.h.s8.bf16 %v155_v17  ;;  %v556_v26 = vunpack.c.l.s8.bf16 %v172_v23  ;;  %v572_v33 = vunpack.c.h.s8.bf16 %v172_v23 }
 0x1af   :  { %1318 = vmatpush1.bf16.msra.mxu0 %v395_v27  ;;  %1400 = vmatpush1.bf16.msra.mxu1 %v397_v28  ;;  %v558_v27 = vunpack.c.l.s8.bf16 %v174_v24  ;;  %v171_v28 = vld [vmem:[#allocation2 + $0x460] sm:$0xff] }
 0x1b0   :  { %1319 = vmatprep.subr.bf16.mxu0 %v412_v29  ;;  %1401 = vmatprep.subr.bf16.mxu1 %v414_v31  ;;  %v173_v29 = vld [vmem:[#allocation2 + $0x470] sm:$0xff]  ;;  %v555_v31 = vunpack.c.l.s8.bf16 %v171_v28 }
 0x1b1   :  { %v557_v32 = vunpack.c.l.s8.bf16 %v173_v29  ;;  %v573_v39 = vunpack.c.h.s8.bf16 %v173_v29 }
 0x1b3   :  { %1320 = vmatpush1.bf16.msra.mxu0 %v411_v34  ;;  %1402 = vmatpush1.bf16.msra.mxu1 %v413_v36  ;;  %v574_v34 = vunpack.c.h.s8.bf16 %v174_v24  ;;  %v188_v36 = vld [vmem:[#allocation2 + $0x4e8] sm:$0xff] }
 0x1b4   :  { %1321 = vmatprep.subr.bf16.mxu0 %v428_v37  ;;  %1403 = vmatprep.subr.bf16.mxu1 %v430_v38  ;;  %v190_v37 = vld [vmem:[#allocation2 + $0x4f8] sm:$0xff]  ;;  %v571_v38 = vunpack.c.h.s8.bf16 %v171_v28  ;;  %v588_v40 = vunpack.c.l.s8.bf16 %v188_v36 }
 0x1b5   :  { %v606_v52 = vunpack.c.h.s8.bf16 %v190_v37 }
 0x1b7   :  { %1322 = vmatpush1.bf16.msra.mxu0 %v427_v41  ;;  %1404 = vmatpush1.bf16.msra.mxu1 %v429_v48  ;;  %v590_v41 = vunpack.c.l.s8.bf16 %v190_v37  ;;  %v187_v48 = vld [vmem:[#allocation2 + $0x4e0] sm:$0xff] }
 0x1b8   :  { %1323 = vmatprep.subr.bf16.mxu0 %v444_v49  ;;  %1405 = vmatprep.subr.bf16.mxu1 %v446_v30  ;;  %v189_v49 = vld [vmem:[#allocation2 + $0x4f0] sm:$0xff]  ;;  %v587_v30 = vunpack.c.l.s8.bf16 %v187_v48 }
 0x1b9   :  { %v589_v51 = vunpack.c.l.s8.bf16 %v189_v49 }
 0x1bb   :  { %1324 = vmatpush1.bf16.msra.mxu0 %v443_v53  ;;  %1406 = vmatpush1.bf16.msra.mxu1 %v445_v54  ;;  %v204_v53 = vld [vmem:[#allocation2 + $0x568] sm:$0xff]  ;;  %v206_v54 = vld [vmem:[#allocation2 + $0x578] sm:$0xff] }
 0x1bc   :  { %1325 = vmatprep.subr.bf16.mxu0 %v460_v55  ;;  %1407 = vmatprep.subr.bf16.mxu1 %v462_v56  ;;  %v603_v55 = vunpack.c.h.s8.bf16 %v187_v48  ;;  %v605_v56 = vunpack.c.h.s8.bf16 %v189_v49  ;;  %v620_v57 = vunpack.c.l.s8.bf16 %v204_v53  ;;  %v622_v58 = vunpack.c.l.s8.bf16 %v206_v54 }
 0x1bd   :  { %v638_v63 = vunpack.c.h.s8.bf16 %v206_v54 }
 0x1bf   :  { %1326 = vmatpush1.bf16.msra.mxu0 %v459_v59  ;;  %1408 = vmatpush1.bf16.msra.mxu1 %v461_v60  ;;  %v203_v59 = vld [vmem:[#allocation2 + $0x560] sm:$0xff] }
 0x1c0   :  { %1327 = vmatprep.subr.bf16.mxu0 %v476_v61  ;;  %1409 = vmatprep.subr.bf16.mxu1 %v478_v62  ;;  %v619_v60 = vunpack.c.l.s8.bf16 %v203_v59  ;;  %v636_v62 = vunpack.c.h.s8.bf16 %v204_v53 }
 0x1c3   :  { %1328 = vmatpush1.bf16.msra.mxu0 %v475_v1  ;;  %1410 = vmatpush1.bf16.msra.mxu1 %v477_v2  ;;  %v222_v1 = vld [vmem:[#allocation2 + $0x5f8] sm:$0xff]  ;;  %v635_v2 = vunpack.c.h.s8.bf16 %v203_v59 }
 0x1c4   :  { %1329 = vmatprep.subr.bf16.mxu0 %v492_v3  ;;  %1411 = vmatprep.subr.bf16.mxu1 %v494_v4  ;;  %v652_v4 = vunpack.c.l.s8.bf16 %v220_v0  ;;  %v654_v5 = vunpack.c.l.s8.bf16 %v222_v1 }
 0x1c7   :  { %1330 = vmatpush1.bf16.msra.mxu0 %v491_v7  ;;  %1412 = vmatpush1.bf16.msra.mxu1 %v493_v8  ;;  %v221_v7 = vld [vmem:[#allocation2 + $0x5f0] sm:$0xff] }
 0x1c8   :  { %1331 = vmatprep.subr.bf16.mxu0 %v508_v9  ;;  %1413 = vmatprep.subr.bf16.mxu1 %v510_v10  ;;  %v669_v23 = vunpack.c.h.s8.bf16 %v221_v7 }
 0x1cb   :  { %1332 = vmatpush1.bf16.msra.mxu0 %v507_v13  ;;  %1414 = vmatpush1.bf16.msra.mxu1 %v509_v14  ;;  %v651_v14 = vunpack.c.l.s8.bf16 %v219_v6 }
 0x1cc   :  { %1333 = vmatprep.subr.bf16.mxu0 %v524_v35  ;;  %1415 = vmatprep.subr.bf16.mxu1 %v526_v15  ;;  %v653_v35 = vunpack.c.l.s8.bf16 %v221_v7 }
 0x1cf   :  { %1334 = vmatpush1.bf16.msra.mxu0 %v523_v19  ;;  %1416 = vmatpush1.bf16.msra.mxu1 %v525_v20  ;;  %v670_v19 = vunpack.c.h.s8.bf16 %v222_v1  ;;  %v236_v20 = vld [vmem:[#allocation2 + $0x668] sm:$0xff] }
 0x1d0   :  { %1335 = vmatprep.subr.bf16.mxu0 %v540_v21  ;;  %1417 = vmatprep.subr.bf16.mxu1 %v542_v22  ;;  %v238_v21 = vld [vmem:[#allocation2 + $0x678] sm:$0xff]  ;;  %v667_v22 = vunpack.c.h.s8.bf16 %v219_v6  ;;  %v684_v24 = vunpack.c.l.s8.bf16 %v236_v20  ;;  %v700_v29 = vunpack.c.h.s8.bf16 %v236_v20 }
 0x1d3   :  { %1336 = vmatpush1.bf16.msra.mxu0 %v539_v43  ;;  %1418 = vmatpush1.bf16.msra.mxu1 %v541_v25  ;;  %v686_v43 = vunpack.c.l.s8.bf16 %v238_v21  ;;  %v235_v25 = vld [vmem:[#allocation2 + $0x660] sm:$0xff] }
 0x1d4   :  { %1346 = vmatprep.subr.bf16.mxu0 %v556_v26  ;;  %1428 = vmatprep.subr.bf16.mxu1 %v558_v27  ;;  %v237_v26 = vld [vmem:[#allocation2 + $0x670] sm:$0xff]  ;;  %v683_v27 = vunpack.c.l.s8.bf16 %v235_v25 }
 0x1d5   :  { %v685_v28 = vunpack.c.l.s8.bf16 %v237_v26 }
 0x1d6   :  { %1338 = vmatmul.mubr.bf16.vlgmr.msra.gmra.mrb[12].mxu0 %v1837_v42  ;;  %1420 = vmatmul.mubr.bf16.vlgmr.msra.gmra.mrb[12].mxu1 %v1837_v42  ;;  %v604_v42 = vunpack.c.h.s8.bf16 %v188_v36  ;;  %v701_v36 = vunpack.c.h.s8.bf16 %v237_v26 }
 0x1d7   :  { %1347 = vmatpush1.bf16.msra.mxu0 %v555_v31  ;;  %1429 = vmatpush1.bf16.msra.mxu1 %v557_v32  ;;  %v702_v31 = vunpack.c.h.s8.bf16 %v238_v21  ;;  %v252_v32 = vld [vmem:[#allocation2 + $0x6e8] sm:$0xff] }
 0x1d8   :  { %1348 = vmatprep.subr.bf16.mxu0 %v572_v33  ;;  %1430 = vmatprep.subr.bf16.mxu1 %v574_v34  ;;  %v254_v33 = vld [vmem:[#allocation2 + $0x6f8] sm:$0xff]  ;;  %v699_v34 = vunpack.c.h.s8.bf16 %v235_v25  ;;  %v716_v37 = vunpack.c.l.s8.bf16 %v252_v32  ;;  %v732_v49 = vunpack.c.h.s8.bf16 %v252_v32 }
 0x1d9   :  { %1378 = vmatprep.mubr.bf16.mxu0 %v1846_v50  ;;  %1460 = vmatprep.mubr.bf16.mxu1 %v1846_v50  ;;  %v205_v50 = vld [vmem:[#allocation2 + $0x570] sm:$0xff] }
 0x1da   :  { %v621_v61 = vunpack.c.l.s8.bf16 %v205_v50  ;;  %v637_v3 = vunpack.c.h.s8.bf16 %v205_v50 }
 0x1db   :  { %1349 = vmatpush1.bf16.msra.mxu0 %v571_v38  ;;  %1431 = vmatpush1.bf16.msra.mxu1 %v573_v39  ;;  %v718_v38 = vunpack.c.l.s8.bf16 %v254_v33  ;;  %v251_v39 = vld [vmem:[#allocation2 + $0x6e0] sm:$0xff] }
 0x1dc   :  { %1350 = vmatprep.subr.bf16.mxu0 %v588_v40  ;;  %1432 = vmatprep.subr.bf16.mxu1 %v590_v41  ;;  %v253_v40 = vld [vmem:[#allocation2 + $0x6f0] sm:$0xff]  ;;  %v715_v41 = vunpack.c.l.s8.bf16 %v251_v39 }
 0x1dd   :  { %v717_v48 = vunpack.c.l.s8.bf16 %v253_v40  ;;  %v733_v53 = vunpack.c.h.s8.bf16 %v253_v40 }
 0x1df   :  { %1351 = vmatpush1.bf16.msra.mxu0 %v587_v30  ;;  %1433 = vmatpush1.bf16.msra.mxu1 %v589_v51  ;;  %v734_v30 = vunpack.c.h.s8.bf16 %v254_v33  ;;  %v268_v51 = vld [vmem:[#allocation2 + $0x768] sm:$0xff] }
 0x1e0   :  { %1352 = vmatprep.subr.bf16.mxu0 %v604_v42  ;;  %1434 = vmatprep.subr.bf16.mxu1 %v606_v52  ;;  %v270_v42 = vld [vmem:[#allocation2 + $0x778] sm:$0xff]  ;;  %v731_v52 = vunpack.c.h.s8.bf16 %v251_v39  ;;  %v748_v54 = vunpack.c.l.s8.bf16 %v268_v51  ;;  %v764_v50 = vunpack.c.h.s8.bf16 %v268_v51 }
 0x1e3   :  { %1353 = vmatpush1.bf16.msra.mxu0 %v603_v55  ;;  %1435 = vmatpush1.bf16.msra.mxu1 %v605_v56  ;;  %v750_v55 = vunpack.c.l.s8.bf16 %v270_v42  ;;  %v267_v56 = vld [vmem:[#allocation2 + $0x760] sm:$0xff] }
 0x1e4   :  { %1354 = vmatprep.subr.bf16.mxu0 %v620_v57  ;;  %1436 = vmatprep.subr.bf16.mxu1 %v622_v58  ;;  %v269_v57 = vld [vmem:[#allocation2 + $0x770] sm:$0xff]  ;;  %v747_v58 = vunpack.c.l.s8.bf16 %v267_v56 }
 0x1e5   :  { %v749_v59 = vunpack.c.l.s8.bf16 %v269_v57  ;;  %v765_v0 = vunpack.c.h.s8.bf16 %v269_v57 }
 0x1e7   :  { %1355 = vmatpush1.bf16.msra.mxu0 %v619_v60  ;;  %1437 = vmatpush1.bf16.msra.mxu1 %v621_v61  ;;  %v766_v60 = vunpack.c.h.s8.bf16 %v270_v42  ;;  %v284_v61 = vld [vmem:[#allocation2 + $0x7e8] sm:$0xff] }
 0x1e8   :  { %1356 = vmatprep.subr.bf16.mxu0 %v636_v62  ;;  %1438 = vmatprep.subr.bf16.mxu1 %v638_v63  ;;  %v286_v62 = vld [vmem:[#allocation2 + $0x7f8] sm:$0xff]  ;;  %v763_v63 = vunpack.c.h.s8.bf16 %v267_v56  ;;  %v780_v1 = vunpack.c.l.s8.bf16 %v284_v61  ;;  %v796_v7 = vunpack.c.h.s8.bf16 %v284_v61 }
 0x1e9   :  { %v1888_v8 = vpop.f32.mrb[4].mxu0  ;;  %v1890_v9 = vpop.f32.mrb[4].mxu1 }
 0x1ea   :  { %v1892_v10 = vpop.f32.mrb[5].mxu0  ;;  %v1894_v11 = vpop.f32.mrb[5].mxu1 }
 0x1eb   :  { %v1056_v12 = vpop.f32.mrb[6].mxu0  ;;  %v1138_v13 = vpop.f32.mrb[6].mxu1  ;;  %1357 = vmatpush1.bf16.msra.mxu0 %v635_v2  ;;  %1439 = vmatpush1.bf16.msra.mxu1 %v637_v3  ;;  %v782_v2 = vunpack.c.l.s8.bf16 %v286_v62  ;;  %v283_v3 = vld [vmem:[#allocation2 + $0x7e0] sm:$0xff] }
 0x1ec   :  { %v1057_v15 = vpop.f32.mrb[7].mxu0  ;;  %v1139_v17 = vpop.f32.mrb[7].mxu1  ;;  %1358 = vmatprep.subr.bf16.mxu0 %v652_v4  ;;  %1440 = vmatprep.subr.bf16.mxu1 %v654_v5  ;;  %v285_v4 = vld [vmem:[#allocation2 + $0x7f0] sm:$0xff]  ;;  %v779_v5 = vunpack.c.l.s8.bf16 %v283_v3  ;;  %v798_v12 = vunpack.c.h.s8.bf16 %v286_v62  ;;  %v795_v13 = vunpack.c.h.s8.bf16 %v283_v3 }
 0x1ed   :  { %v781_v6 = vunpack.c.l.s8.bf16 %v285_v4 }
 0x1ef   :  { %1359 = vmatpush1.bf16.msra.mxu0 %v651_v14  ;;  %1441 = vmatpush1.bf16.msra.mxu1 %v653_v35  ;;  %v797_v14 = vunpack.c.h.s8.bf16 %v285_v4  ;;  %v1473_v35 = vlaneseq }
 0x1f0   :  { %1360 = vmatprep.subr.bf16.mxu0 %v668_v18  ;;  %1442 = vmatprep.subr.bf16.mxu1 %v670_v19  ;;  %v1904_v18 = vld [vmem:[%s1956_s2] sm:$0xff] }
 0x1f1   :  { %v1898_v15 = vshrl.u32 %v1473_v35, 7 }
 0x1f3   :  { %1361 = vmatpush1.bf16.msra.mxu0 %v667_v22  ;;  %1443 = vmatpush1.bf16.msra.mxu1 %v669_v23  ;;  %v1475_v17 = vsub.s32 0, %v1898_v15  ;;  %v1483_v19 = vsub.s32 2, %v1898_v15  ;;  %v1479_v20 = vsub.s32 1, %v1898_v15  ;;  %v1487_v21 = vsub.s32 3, %v1898_v15 }
 0x1f4   :  { %1362 = vmatprep.subr.bf16.mxu0 %v684_v24  ;;  %1444 = vmatprep.subr.bf16.mxu1 %v686_v43 }
 0x1f5   :  { %v1476_v22 = vrot.slane %v1904_v18, %v1475_v17  ;;  %v1480_v23 = vrot.slane %v1904_v18, %v1479_v20  ;;  %v1488_v24 = vrot.slane %v1904_v18, %v1487_v21 }
 0x1f7   :  { %1363 = vmatpush1.bf16.msra.mxu0 %v683_v27  ;;  %1445 = vmatpush1.bf16.msra.mxu1 %v685_v28  ;;  %v1553_v43 = vmul.f32 %v1476_v22, %v1872_v44  ;;  %v1554_v26 = vmul.f32 %v1480_v23, %v1876_v46  ;;  %v1556_v27 = vmul.f32 %v1488_v24, %v1878_v47  ;;  %v1920_v46 = vld [vmem:[%s1956_s2 + $0x8] sm:$0xff]  ;;  %s1791_s2 = smov [#allocation5]  }
 0x1f8   :  { %1364 = vmatprep.subr.bf16.mxu0 %v700_v29  ;;  %1446 = vmatprep.subr.bf16.mxu1 %v702_v31  ;;  %v1520_v51 = vrot.slane %v1920_v46, %v1487_v21  ;;  %s1647_s5 = sshll.u32 %s1791_s2, 4  ;;  %s1648_s5 = int_to_ptr.vmem [resolvable:$true] %s1647_s5 }
 0x1f9   :  { %v1660_v28 = vmul.f32 -1.442695, %v1553_v43  ;;  %v1661_v31 = vmul.f32 -1.442695, %v1554_v26  ;;  %v1663_v32 = vmul.f32 -1.442695, %v1556_v27  ;;  %p1767_p9 = scmp.lt.s32.totalorder %s1648_s5, %s1648_s5 }
 0x1fa   :  { %s1762_s6 = scalar_lea.vmem %s1648_s5, 1024 }
 0x1fb   :  { %1365 = vmatpush1.bf16.msra.mxu0 %v699_v34  ;;  %1447 = vmatpush1.bf16.msra.mxu1 %v701_v36  ;;  %1708 = vpow2.f32 %v1660_v28  ;;  %p1763_p8 = scmp.ne.s32.totalorder %s1648_s5, %s1762_s6  ;;  %p1768_p10 = scmp.lt.s32.totalorder %s1762_s6, %s1762_s6 }
 0x1fc   :  { %1366 = vmatprep.subr.bf16.mxu0 %v716_v37  ;;  %1448 = vmatprep.subr.bf16.mxu1 %v718_v38 }
 0x1fd   :  { %p1769_p11 = por %p1768_p10, %p1767_p9 }
 0x1ff   :  { %1367 = vmatpush1.bf16.msra.mxu0 %v715_v41  ;;  %1449 = vmatpush1.bf16.msra.mxu1 %v717_v48  ;;  %v1508_v41 = vrot.slane %v1920_v46, %v1475_v17  ;;  %v1516_v48 = vrot.slane %v1920_v46, %v1483_v19  ;;  %p1770_p12 = pnand %p1769_p11, %p1763_p8 }
 0x200   :  { %1368 = vmatprep.subr.bf16.mxu0 %v732_v49  ;;  %1450 = vmatprep.subr.bf16.mxu1 %v734_v30  ;;  %v1512_v30 = vrot.slane %v1920_v46, %v1479_v20 }
 0x203   :  { %1369 = vmatpush1.bf16.msra.mxu0 %v731_v52  ;;  %1451 = vmatpush1.bf16.msra.mxu1 %v733_v53 }
 0x204   :  { %1370 = vmatprep.subr.bf16.mxu0 %v748_v54  ;;  %1452 = vmatprep.subr.bf16.mxu1 %v750_v55 }
 0x205   :  { %v1709_v33 = vpop.eup %1708 }
 0x206   :  { %v1593_v38 = vadd.f32 1.0, %v1709_v33 }
 0x207   :  { %1371 = vmatpush1.bf16.msra.mxu0 %v747_v58  ;;  %1453 = vmatpush1.bf16.msra.mxu1 %v749_v59 }
 0x208   :  { %1372 = vmatprep.subr.bf16.mxu0 %v764_v50  ;;  %1454 = vmatprep.subr.bf16.mxu1 %v766_v60 }
 0x20b   :  { %1373 = vmatpush1.bf16.msra.mxu0 %v763_v63  ;;  %1455 = vmatpush1.bf16.msra.mxu1 %v765_v0 }
 0x20c   :  { %1374 = vmatprep.subr.bf16.mxu0 %v780_v1  ;;  %1456 = vmatprep.subr.bf16.mxu1 %v782_v2 }
 0x20f   :  { %1375 = vmatpush1.bf16.msra.mxu0 %v779_v5  ;;  %1457 = vmatpush1.bf16.msra.mxu1 %v781_v6 }
 0x210   :  { %1376 = vmatprep.subr.bf16.mxu0 %v796_v7  ;;  %1458 = vmatprep.subr.bf16.mxu1 %v798_v12  ;;  %v1491_v7 = vsub.s32 4, %v1898_v15  ;;  %v1499_v12 = vsub.s32 6, %v1898_v15 }
 0x212   :  { %v1492_v35 = vrot.slane %v1904_v18, %v1491_v7  ;;  %v1500_v17 = vrot.slane %v1904_v18, %v1499_v12  ;;  %v1532_v33 = vrot.slane %v1920_v46, %v1499_v12 }
 0x213   :  { %1377 = vmatpush1.bf16.msra.mxu0 %v795_v13  ;;  %1459 = vmatpush1.bf16.msra.mxu1 %v797_v14  ;;  %v1495_v13 = vsub.s32 5, %v1898_v15  ;;  %v1503_v14 = vsub.s32 7, %v1898_v15 }
 0x214   :  { %v1557_v21 = vmul.f32 %v1492_v35, %v1888_v8  ;;  %v1559_v22 = vmul.f32 %v1500_v17, %v1890_v9 }
 0x215   :  { %v1504_v20 = vrot.slane %v1904_v18, %v1503_v14 }
 0x216   :  { %1379 = vmatmul.mubr.bf16.vlgmr.msra.gmra.mrb[12].mxu0 %v1854_v16  ;;  %1461 = vmatmul.mubr.bf16.vlgmr.msra.gmra.mrb[12].mxu1 %v1854_v16  ;;  %v1484_v16 = vrot.slane %v1904_v18, %v1483_v19  ;;  %v1496_v19 = vrot.slane %v1904_v18, %v1495_v13  ;;  %v1664_v24 = vmul.f32 -1.442695, %v1557_v21 }
 0x217   :  { %v1560_v23 = vmul.f32 %v1504_v20, %v1894_v11 }
 0x218   :  { %v1555_v25 = vmul.f32 %v1484_v16, %v1874_v45  ;;  %v1558_v16 = vmul.f32 %v1496_v19, %v1892_v10 }
 0x219   :  { %v1667_v15 = vmul.f32 -1.442695, %v1560_v23 }
 0x21a   :  { %v1662_v29 = vmul.f32 -1.442695, %v1555_v25 }
 0x21c   :  { %1710 = vpow2.f32 %v1662_v29 }
 0x21d   :  { %1712 = vpow2.f32 %v1661_v31 }
 0x21e   :  { %1714 = vpow2.f32 %v1663_v32  ;;  %v1524_v32 = vrot.slane %v1920_v46, %v1491_v7 }
 0x21f   :  { %1716 = vrcp.f32 %v1593_v38 }
 0x226   :  { %v1711_v34 = vpop.eup %1710 }
 0x227   :  { %v1713_v36 = vpop.eup %1712  ;;  %v1595_v44 = vadd.f32 1.0, %v1711_v34 }
 0x228   :  { %v1715_v37 = vpop.eup %1714  ;;  %v1594_v39 = vadd.f32 1.0, %v1713_v36  ;;  %v1528_v36 = vrot.slane %v1920_v46, %v1495_v13 }
 0x229   :  { %v1596_v45 = vadd.f32 1.0, %v1715_v37  ;;  %1718 = vrcp.f32 %v1595_v44  ;;  %v1717_v47 = vpop.eup %1716  ;;  %v1536_v37 = vrot.slane %v1920_v46, %v1503_v14 }
 0x22a   :  { %1720 = vrcp.f32 %v1594_v39  ;;  %v1617_v54 = vmul.f32 %v1717_v47, %v1553_v43  ;;  %v1666_v43 = vmul.f32 -1.442695, %v1559_v22 }
 0x22b   :  { %1722 = vrcp.f32 %v1596_v45 }
 0x22c   :  { %1724 = vpow2.f32 %v1664_v24 }
 0x22d   :  { %1726 = vpow2.f32 %v1666_v43 }
 0x233   :  { %v1719_v40 = vpop.eup %1718 }
 0x234   :  { %v1721_v49 = vpop.eup %1720  ;;  %v1619_v55 = vmul.f32 %v1719_v40, %v1555_v25  ;;  %v1665_v25 = vmul.f32 -1.442695, %v1558_v16 }
 0x235   :  { %v1723_v42 = vpop.eup %1722  ;;  %v1618_v50 = vmul.f32 %v1721_v49, %v1554_v26 }
 0x236   :  { %v1620_v60 = vmul.f32 %v1723_v42, %v1556_v27  ;;  %1728 = vpow2.f32 %v1665_v25  ;;  %v1725_v26 = vpop.eup %1724 }
 0x237   :  { %1730 = vpow2.f32 %v1667_v15  ;;  %v1727_v27 = vpop.eup %1726  ;;  %v1597_v29 = vadd.f32 1.0, %v1725_v26 }
 0x238   :  { %v1599_v8 = vadd.f32 1.0, %v1727_v27 }
 0x239   :  { %1732 = vrcp.f32 %v1597_v29 }
 0x23a   :  { %1734 = vrcp.f32 %v1599_v8 }
 0x240   :  { %v1729_v28 = vpop.eup %1728 }
 0x241   :  { %v1731_v18 = vpop.eup %1730  ;;  %v1598_v31 = vadd.f32 1.0, %v1729_v28 }
 0x242   :  { %v1600_v9 = vadd.f32 1.0, %v1731_v18 }
 0x243   :  { %1736 = vrcp.f32 %v1598_v31  ;;  %v1733_v10 = vpop.eup %1732 }
 0x244   :  { %1738 = vrcp.f32 %v1600_v9  ;;  %v1735_v11 = vpop.eup %1734  ;;  %v1621_v45 = vmul.f32 %v1733_v10, %v1557_v21 }
 0x245   :  { %v1623_v47 = vmul.f32 %v1735_v11, %v1559_v22 }
 0x24d   :  { %v1737_v34 = vpop.eup %1736 }
 0x24e   :  { %v1739_v38 = vpop.eup %1738 }
 0x269   :  { %v1216_v52 = vpop.f32.mrb[8].mxu0  ;;  %v1298_v53 = vpop.f32.mrb[8].mxu1 }
 0x26a   :  { %v1561_v56 = vmul.f32 %v1508_v41, %v1216_v52  ;;  %v1563_v57 = vmul.f32 %v1516_v48, %v1298_v53  ;;  %v1218_v58 = vpop.f32.mrb[9].mxu0  ;;  %v1300_v59 = vpop.f32.mrb[9].mxu1 }
 0x26b   :  { %v1562_v61 = vmul.f32 %v1512_v30, %v1218_v58  ;;  %v1564_v62 = vmul.f32 %v1520_v51, %v1300_v59  ;;  %v1220_v63 = vpop.f32.mrb[10].mxu0  ;;  %v1302_v0 = vpop.f32.mrb[10].mxu1  ;;  %v1622_v30 = vmul.f32 %v1737_v34, %v1558_v16  ;;  %v1624_v51 = vmul.f32 %v1739_v38, %v1560_v23 }
 0x26c   :  { %v1625_v1 = vmul.f32 %v1617_v54, %v1561_v56  ;;  %v1627_v2 = vmul.f32 %v1619_v55, %v1563_v57  ;;  %v1221_v3 = vpop.f32.mrb[11].mxu0  ;;  %v1303_v4 = vpop.f32.mrb[11].mxu1 }
 0x26d   :  { %v1626_v5 = vmul.f32 %v1618_v50, %v1562_v61  ;;  %v1628_v6 = vmul.f32 %v1620_v60, %v1564_v62 }
 0x26e   :  { %1633 = vst [vmem:[#allocation5] sm:$0xff] %v1625_v1  ;;  %1635 = vst [vmem:[#allocation5 + $0x10] sm:$0xff] %v1627_v2 }
 0x26f   :  { %1634 = vst [vmem:[#allocation5 + $0x8] sm:$0xff] %v1626_v5  ;;  %1636 = vst [vmem:[#allocation5 + $0x18] sm:$0xff] %v1628_v6 }
 0x2e9   :  { %v1380_v44 = vpop.f32.mrb[12].mxu0  ;;  %v1462_v39 = vpop.f32.mrb[12].mxu1 }
 0x2ea   :  { %v1565_v40 = vmul.f32 %v1524_v32, %v1380_v44  ;;  %v1567_v41 = vmul.f32 %v1532_v33, %v1462_v39  ;;  %v1382_v48 = vpop.f32.mrb[13].mxu0  ;;  %v1464_v49 = vpop.f32.mrb[13].mxu1 }
 0x2eb   :  { %v1566_v42 = vmul.f32 %v1528_v36, %v1382_v48  ;;  %v1568_v52 = vmul.f32 %v1536_v37, %v1464_v49  ;;  %v1384_v53 = vpop.f32.mrb[14].mxu0  ;;  %v1466_v54 = vpop.f32.mrb[14].mxu1 }
 0x2ec   :  { %v1629_v55 = vmul.f32 %v1621_v45, %v1565_v40  ;;  %v1631_v56 = vmul.f32 %v1623_v47, %v1567_v41  ;;  %v1385_v46 = vpop.f32.mrb[15].mxu0  ;;  %v1467_v57 = vpop.f32.mrb[15].mxu1 }
 0x2ed   :  { %v1630_v58 = vmul.f32 %v1622_v30, %v1566_v42  ;;  %v1632_v59 = vmul.f32 %v1624_v51, %v1568_v52 }
 0x2ee   :  { %1637 = vst [vmem:[#allocation5 + $0x20] sm:$0xff] %v1629_v55  ;;  %1639 = vst [vmem:[#allocation5 + $0x30] sm:$0xff] %v1631_v56 }
 0x2ef   :  { %1638 = vst [vmem:[#allocation5 + $0x28] sm:$0xff] %v1630_v58  ;;  %1640 = vst [vmem:[#allocation5 + $0x38] sm:$0xff] %v1632_v59 }
 0x2f0   :  { %1773 = shalt.err (!%p1770_p12)
}
 0x2f1   :  { %s1774_s9 = scalar_lea.hbm %s1957_s3, 1024 }
 0x2f2   :  { %p1775_p13 = scmp.ne.s32.totalorder %s1957_s3, %s1774_s9  ;;  %p1778_p0 = scmp.lt.u32.totalorder %s1774_s9, %s1957_s3 }
 0x2f4   :  { %p1780_p1 = pnand %p1778_p0, %p1775_p13 }
 0x2f6   :  { %1783 = shalt.err (!%p1780_p1)
}
 0x2f7   :  { %1650 = dma.vmem_to_hbm [thread:$0]  %s1648_s5, 1024, %s1957_s3, [#allocation4]  }
 0x2f8   :  { %1786 = dma.done.wait [#allocation4], 1024  }
 0x2f9   :  { %1787 = vsyncadd [#allocation4], 4294966272 }
 0x2fa   :  { %1654 = vsyncpa [#allocation3], 1 }
 0x2fb   :  { %1655 = vsyncpa [#allocation4], 1 }

</bundles_post_ra>
